<compile_context>
chip_gen: v7x
topology: tpu7x:2x2x1
jax: 0.10.0
libtpu: 0.0.40
codegen_flags: <defaults>
</compile_context>

<pallas_src>
import math

import jax
import jax.numpy as jnp
from jax import lax
from jax.experimental import pallas as pl
from jax.experimental.pallas import tpu as pltpu


# Explicit scoped-VMEM budget: fits v7x's 64 MiB physical VMEM with headroom, and is
# well under v5e/v6e's 128 MiB (their scoped defaults of 16/32 MiB would be too small
# for the wide mid-level weights once double-buffered).
_VMEM_LIMIT_BYTES = 48 * 1024 * 1024


def _round_up(x, m):
    return ((x + m - 1) // m) * m


def _cpad(c):
    return _round_up(max(int(c), 1), 128)


def _compiler_params(n_grid_axes=1):
    # batch grid axis is "parallel": shards across v7x's 2 TensorCores (no-op on v5e/v6e)
    return pltpu.CompilerParams(
        dimension_semantics=("parallel",) * n_grid_axes,
        vmem_limit_bytes=_VMEM_LIMIT_BYTES)


def _const_spec(a):
    """Full-array block that stays at block index 0 for every grid step (resident weights)."""
    if a.ndim == 2:
        return pl.BlockSpec(a.shape, lambda b: (0, 0))
    return pl.BlockSpec(a.shape, lambda b: (0, 0, 0))


# ----------------------------------------------------------------------------
# In-kernel value helpers
# ----------------------------------------------------------------------------
def _mish(x):
    # x * tanh(softplus(x)); logaddexp(x, 0) is a numerically-stable softplus (EUP ops).
    return x * jnp.tanh(jnp.logaddexp(x, 0.0))


def _shift_rows(x, s):
    """y[r] = x[r + s]; rows outside [0, N) become 0 (forms conv taps on the slab)."""
    n = x.shape[0]
    if s == 0:
        return x
    if s > 0:
        pad = jnp.zeros((s,) + x.shape[1:], x.dtype)
        return jnp.concatenate([x[s:], pad], axis=0)
    pad = jnp.zeros((-s,) + x.shape[1:], x.dtype)
    return jnp.concatenate([pad, x[: n + s]], axis=0)


def _conv_k_dots(x_f32, w_ref, K, p, compute_dtype):
    """Conv1d(K, pad=K//2) as K accumulated MXU dots (no (N, K*C) im2col slab).

    Taps are shifted in f32 (robust 32-bit sublane concat) and cast to compute_dtype
    per-tap right before the matmul, so only one tap is live at a time."""
    f32 = jnp.float32
    acc = None
    for k in range(K):
        tap = _shift_rows(x_f32, k - p).astype(compute_dtype)
        c = jnp.dot(tap, w_ref[k], preferred_element_type=f32)
        acc = c if acc is None else acc + c
    return acc


def _valid_rows_mask(Tp8, p, T):
    r = lax.broadcasted_iota(jnp.int32, (Tp8, 1), 0)
    return ((r >= p) & (r < p + T)).astype(jnp.float32)


def _group_masks_iota(Cpad, cout_real, G):
    """(Cpad, G) and (G, Cpad) one-hot group-membership masks; padded channels belong
    to no group (their gamma/beta are zero, so they stay exactly 0)."""
    cg = cout_real // G
    c = lax.broadcasted_iota(jnp.int32, (Cpad, G), 0)
    g = lax.broadcasted_iota(jnp.int32, (Cpad, G), 1)
    mg = ((c >= g * cg) & (c < (g + 1) * cg)).astype(jnp.float32)
    gT = lax.broadcasted_iota(jnp.int32, (G, Cpad), 0)
    cT = lax.broadcasted_iota(jnp.int32, (G, Cpad), 1)
    mgT = ((cT >= gT * cg) & (cT < (gT + 1) * cg)).astype(jnp.float32)
    return mg, mgT


def _group_norm_rows(a, valid, mg, mgT, gamma, beta, inv_cnt, eps):
    """GroupNorm over one batch element's slab.  a: (Tp8, C) f32, valid: (Tp8, 1).

    Stats: row reduction (XLU) -> tiny (1,C)x(C,G) group matmuls -> broadcast back over
    rows for free (VPU).  Variance is computed from centered values."""
    f32 = jnp.float32
    s = jnp.sum(a * valid, axis=0, keepdims=True)                       # (1, C)
    mean_g = jnp.dot(s, mg, preferred_element_type=f32) * inv_cnt       # (1, G)
    mean_c = jnp.dot(mean_g, mgT, preferred_element_type=f32)           # (1, C)
    d = (a - mean_c) * valid                                            # centered, 0 on pad rows
    v = jnp.sum(d * d, axis=0, keepdims=True)                           # (1, C)
    var_g = jnp.dot(v, mg, preferred_element_type=f32) * inv_cnt        # (1, G)
    var_c = jnp.dot(var_g, mgT, preferred_element_type=f32)             # (1, C)
    return d * lax.rsqrt(var_c + eps) * gamma + beta


# ----------------------------------------------------------------------------
# Pallas kernels (each grid step = one batch element's slab)
# ----------------------------------------------------------------------------
def _make_resblock_kernel(*, T, p, Tp8, K, Cout, cout_real, G, has_res,
                          compute_dtype, eps=1e-5):
    """Fused ConditionalResidualBlock1D (cond_predict_scale=False):
       Conv(K)+GN+Mish -> FiLM bias add -> Conv(K)+GN+Mish -> residual add."""
    inv_cnt = 1.0 / float(T * (cout_real // G))

    def kernel(*refs):
        if has_res:
            (x_ref, w0_ref, b0_ref, g0_ref, be0_ref, emb_ref,
             w1_ref, b1_ref, g1_ref, be1_ref, rw_ref, rb_ref, o_ref) = refs
        else:
            (x_ref, w0_ref, b0_ref, g0_ref, be0_ref, emb_ref,
             w1_ref, b1_ref, g1_ref, be1_ref, o_ref) = refs

        f32 = jnp.float32
        valid = _valid_rows_mask(Tp8, p, T)                       # (Tp8, 1)
        mg, mgT = _group_masks_iota(Cout, cout_real, G)

        x_c = x_ref[...]                                          # (Tp8, Cin), pad rows zero
        x32 = x_c.astype(f32)

        # ---- Conv1dBlock #0 : Conv(K) -> GroupNorm -> Mish
        a0 = _conv_k_dots(x32, w0_ref, K, p, compute_dtype) + b0_ref[...]
        y = _mish(_group_norm_rows(a0, valid, mg, mgT,
                                   g0_ref[...], be0_ref[...], inv_cnt, eps))

        # ---- FiLM bias (precomputed per-block in the wrapper), re-zero pad rows (f32)
        y = (y + emb_ref[...]) * valid

        # ---- Conv1dBlock #1 : Conv(K) -> GroupNorm -> Mish
        a1 = _conv_k_dots(y, w1_ref, K, p, compute_dtype) + b1_ref[...]
        y = _mish(_group_norm_rows(a1, valid, mg, mgT,
                                   g1_ref[...], be1_ref[...], inv_cnt, eps))

        # ---- residual path (1x1 conv or identity)
        if has_res:
            res = jnp.dot(x_c, rw_ref[...], preferred_element_type=f32) + rb_ref[...]
        else:
            res = x32
        o_ref[...] = ((y + res) * valid).astype(o_ref.dtype)      # pad rows stay zero

    return kernel


def _make_final_kernel(*, T, p, Tp8, K, Cmid, cmid_real, G, compute_dtype, eps=1e-5):
    """final_conv = Conv1dBlock(Cmid->Cmid) + Conv1d(Cmid->Dout, 1), fused."""
    inv_cnt = 1.0 / float(T * (cmid_real // G))

    def kernel(x_ref, w0_ref, b0_ref, g0_ref, be0_ref, wf_ref, bf_ref, o_ref):
        f32 = jnp.float32
        valid = _valid_rows_mask(Tp8, p, T)
        mg, mgT = _group_masks_iota(Cmid, cmid_real, G)
        x32 = x_ref[...].astype(f32)
        a0 = _conv_k_dots(x32, w0_ref, K, p, compute_dtype) + b0_ref[...]
        y = _mish(_group_norm_rows(a0, valid, mg, mgT,
                                   g0_ref[...], be0_ref[...], inv_cnt, eps))
        out = jnp.dot(y.astype(compute_dtype), wf_ref[...],
                      preferred_element_type=f32) + bf_ref[...]
        o_ref[...] = (out * valid).astype(o_ref.dtype)

    return kernel


def _make_mid_ctrl_kernel(*, T, p, Tp8):
    """zero_module(Conv1d(mid, mid, 1)) + pad-row re-zero + 'x = x + x_hat' — fused."""
    def kernel(xh_ref, w_ref, b_ref, xb_ref, o_ref):
        f32 = jnp.float32
        valid = _valid_rows_mask(Tp8, p, T)
        y = jnp.dot(xh_ref[...], w_ref[...], preferred_element_type=f32) + b_ref[...]
        o_ref[...] = (y * valid + xb_ref[...].astype(f32)).astype(o_ref.dtype)
    return kernel


def _make_cols_to_slab_kernel(*, T_out, Tp8_out, p, Cout):
    """(T_out, K*C) cols @ (K*C, C) + bias, written directly as a zero-padded slab."""
    def kernel(cols_ref, w_ref, b_ref, o_ref):
        f32 = jnp.float32
        y = jnp.dot(cols_ref[...], w_ref[...], preferred_element_type=f32) + b_ref[...]
        top = jnp.zeros((p, Cout), f32)
        bot = jnp.zeros((Tp8_out - p - T_out, Cout), f32)
        o_ref[...] = jnp.concatenate([top, y, bot], axis=0).astype(o_ref.dtype)
    return kernel


# ----------------------------------------------------------------------------
# pallas_call wrappers (grid over batch, weights resident)
# ----------------------------------------------------------------------------
def resblock_pallas(x_slab, emb, prm, *, T, p, G, cout_real, compute_dtype):
    B, Tp8, Cin = x_slab.shape
    K = prm["w0"].shape[0]
    Cout = prm["w0"].shape[2]
    has_res = "rw" in prm
    args = [x_slab, prm["w0"], prm["b0"], prm["g0"], prm["be0"], emb,
            prm["w1"], prm["b1"], prm["g1"], prm["be1"]]
    if has_res:
        args += [prm["rw"], prm["rb"]]
    in_specs = [pl.BlockSpec((None, Tp8, Cin), lambda b: (b, 0, 0)),
                _const_spec(prm["w0"]), _const_spec(prm["b0"]),
                _const_spec(prm["g0"]), _const_spec(prm["be0"]),
                pl.BlockSpec((None, 1, Cout), lambda b: (b, 0, 0)),
                _const_spec(prm["w1"]), _const_spec(prm["b1"]),
                _const_spec(prm["g1"]), _const_spec(prm["be1"])]
    if has_res:
        in_specs += [_const_spec(prm["rw"]), _const_spec(prm["rb"])]
    return pl.pallas_call(
        _make_resblock_kernel(T=T, p=p, Tp8=Tp8, K=K, Cout=Cout, cout_real=cout_real,
                              G=G, has_res=has_res, compute_dtype=compute_dtype),
        out_shape=jax.ShapeDtypeStruct((B, Tp8, Cout), compute_dtype),
        grid=(B,),
        in_specs=in_specs,
        out_specs=pl.BlockSpec((None, Tp8, Cout), lambda b: (b, 0, 0)),
        compiler_params=_compiler_params(),
    )(*args)


def final_conv_pallas(x_slab, prm, *, T, p, G, cmid_real, compute_dtype):
    B, Tp8, Cmid = x_slab.shape
    K = prm["w0"].shape[0]
    Cout = prm["wf"].shape[1]
    args = [x_slab, prm["w0"], prm["b0"], prm["g0"], prm["be0"], prm["wf"], prm["bf"]]
    in_specs = [pl.BlockSpec((None, Tp8, Cmid), lambda b: (b, 0, 0))] + \
               [_const_spec(a) for a in args[1:]]
    return pl.pallas_call(
        _make_final_kernel(T=T, p=p, Tp8=Tp8, K=K, Cmid=Cmid, cmid_real=cmid_real,
                           G=G, compute_dtype=compute_dtype),
        out_shape=jax.ShapeDtypeStruct((B, Tp8, Cout), jnp.float32),
        grid=(B,),
        in_specs=in_specs,
        out_specs=pl.BlockSpec((None, Tp8, Cout), lambda b: (b, 0, 0)),
        compiler_params=_compiler_params(),
    )(*args)


def mid_controlnet_pallas(x_hat, x_base, prm, *, T, p, compute_dtype):
    B, Tp8, C = x_hat.shape
    return pl.pallas_call(
        _make_mid_ctrl_kernel(T=T, p=p, Tp8=Tp8),
        out_shape=jax.ShapeDtypeStruct((B, Tp8, C), compute_dtype),
        grid=(B,),
        in_specs=[pl.BlockSpec((None, Tp8, C), lambda b: (b, 0, 0)),
                  _const_spec(prm["w"]), _const_spec(prm["b"]),
                  pl.BlockSpec((None, Tp8, C), lambda b: (b, 0, 0))],
        out_specs=pl.BlockSpec((None, Tp8, C), lambda b: (b, 0, 0)),
        compiler_params=_compiler_params(),
    )(x_hat, prm["w"], prm["b"], x_base)


def _cols_to_slab_call(cols, w, b, *, T_out, p, C, compute_dtype):
    B = cols.shape[0]
    Tp8_out = _round_up(T_out + 2 * p, 8)
    return pl.pallas_call(
        _make_cols_to_slab_kernel(T_out=T_out, Tp8_out=Tp8_out, p=p, Cout=C),
        out_shape=jax.ShapeDtypeStruct((B, Tp8_out, C), compute_dtype),
        grid=(B,),
        in_specs=[pl.BlockSpec((None, T_out, cols.shape[-1]), lambda b_: (b_, 0, 0)),
                  _const_spec(w), _const_spec(b)],
        out_specs=pl.BlockSpec((None, Tp8_out, C), lambda b_: (b_, 0, 0)),
        compiler_params=_compiler_params(),
    )(cols, w, b)


def downsample1d_pallas(x_slab, prm, *, T, p, compute_dtype):
    """Downsample1d = Conv1d(C, C, 3, stride=2, padding=1)."""
    # TODO(synk): build the stride-2 taps in-kernel with strided ds loads to drop one HBM pass.
    B, Tp8, C = x_slab.shape
    assert T % 2 == 0
    T_out = T // 2
    taps = [x_slab[:, p - 1 + k: p - 1 + k + 2 * T_out - 1: 2, :] for k in range(3)]
    cols = jnp.concatenate(taps, axis=-1)                        # (B, T_out, 3C)
    out = _cols_to_slab_call(cols, prm["w"], prm["b"], T_out=T_out, p=p, C=C,
                             compute_dtype=compute_dtype)
    return out, T_out


def upsample1d_pallas(x_slab, prm, *, T, p, compute_dtype):
    """Upsample1d = ConvTranspose1d(C, C, 4, stride=2, padding=1) as a correlation of the
    flipped kernel over the zero-dilated, edge-padded input."""
    # TODO(synk): build the zero-dilated taps in-kernel to drop one more HBM pass.
    B, Tp8, C = x_slab.shape
    T_out = 2 * T
    x = x_slab[:, p:p + T, :]
    xd = jnp.zeros((B, 2 * T - 1, C), x_slab.dtype).at[:, ::2, :].set(x)
    xdp = jnp.pad(xd, ((0, 0), (2, 2), (0, 0)))
    cols = jnp.concatenate([xdp[:, j:j + T_out, :] for j in range(4)], axis=-1)
    out = _cols_to_slab_call(cols, prm["w"], prm["b"], T_out=T_out, p=p, C=C,
                             compute_dtype=compute_dtype)
    return out, T_out


# ----------------------------------------------------------------------------
# Slab layout glue + tiny pure-JAX pieces (fused by XLA under jit)
# ----------------------------------------------------------------------------
def _to_slab(x_btc, p, Tp8, cpad, dtype):
    B, T, C = x_btc.shape
    out = jnp.zeros((B, Tp8, cpad), dtype)
    return out.at[:, p:p + T, :C].set(x_btc.astype(dtype))


def _from_slab(x_slab, T, p, c_real):
    return x_slab[:, p:p + T, :c_real]


def _mish_f32(x):
    return x * jnp.tanh(jax.nn.softplus(x))


def _sinusoidal_pos_emb(t, dim):
    half = dim // 2
    scale = math.log(10000.0) / (half - 1)
    freqs = jnp.exp(jnp.arange(half, dtype=jnp.float32) * -scale)
    args = t.astype(jnp.float32)[:, None] * freqs[None, :]
    return jnp.concatenate([jnp.sin(args), jnp.cos(args)], axis=-1)


# ----------------------------------------------------------------------------
# Synthetic parameter init (real / unpadded, torch-equivalent layouts)
# ----------------------------------------------------------------------------
class _KeyGen:
    def __init__(self, key):
        self._key = key

    def __call__(self):
        self._key, sub = jax.random.split(self._key)
        return sub


def _randn(kg, shape, scale=0.05):
    return scale * jax.random.normal(kg(), shape, jnp.float32)


def _init_conv_block(kg, cin, cout, K):
    return {"w": _randn(kg, (K, cin, cout)), "b": _randn(kg, (cout,)),
            "g": jnp.ones((cout,), jnp.float32), "be": jnp.zeros((cout,), jnp.float32)}


def _init_resblock(kg, cin, cout, cond_dim, K):
    b0 = _init_conv_block(kg, cin, cout, K)
    b1 = _init_conv_block(kg, cout, cout, K)
    prm = {"w0": b0["w"], "b0": b0["b"], "g0": b0["g"], "be0": b0["be"],
           "w1": b1["w"], "b1": b1["b"], "g1": b1["g"], "be1": b1["be"],
           "cw": _randn(kg, (cond_dim, cout)), "cb": _randn(kg, (cout,))}
    if cin != cout:
        prm["rw"] = _randn(kg, (cin, cout))
        prm["rb"] = _randn(kg, (cout,))
    return prm


def init_controlnet_params(key, input_dim, global_cond_dim, dsed, down_dims, kernel_size):
    kg = _KeyGen(key)
    K = kernel_size
    all_dims = [input_dim] + list(down_dims)
    in_out = list(zip(all_dims[:-1], all_dims[1:]))
    num_res = len(in_out)
    cond_dim = dsed + (global_cond_dim if global_cond_dim is not None else 0)

    def encoder():
        levels = []
        for ind, (din, dout) in enumerate(in_out):
            is_last = ind >= num_res - 1
            levels.append({"res1": _init_resblock(kg, din, dout, cond_dim, K),
                           "res2": _init_resblock(kg, dout, dout, cond_dim, K),
                           "down": None if is_last else
                           {"w": _randn(kg, (3, dout, dout)), "b": _randn(kg, (dout,))}})
        return levels

    params = {"time_mlp": {"w1": _randn(kg, (dsed, dsed * 4)), "b1": _randn(kg, (dsed * 4,)),
                           "w2": _randn(kg, (dsed * 4, dsed)), "b2": _randn(kg, (dsed,))}}
    params["downs"] = encoder()
    mid_dim = all_dims[-1]
    params["mid"] = [_init_resblock(kg, mid_dim, mid_dim, cond_dim, K) for _ in range(2)]
    params["copy_downs"] = encoder()
    params["copy_mid"] = [_init_resblock(kg, mid_dim, mid_dim, cond_dim, K) for _ in range(2)]
    params["mid_controlnet"] = {"w": jnp.zeros((mid_dim, mid_dim), jnp.float32),
                                "b": jnp.zeros((mid_dim,), jnp.float32)}
    # NOTE: self.controlnet_blocks (zero 1x1 convs) are built in __init__ but never used
    #       in forward(); omitted here.
    ups = []
    for ind, (din, dout) in enumerate(reversed(in_out[1:])):
        is_last = ind >= num_res - 1
        ups.append({"res1": _init_resblock(kg, dout * 2, din, cond_dim, K),
                    "res2": _init_resblock(kg, din, din, cond_dim, K),
                    "up": None if is_last else
                    {"w": _randn(kg, (4, din, din)), "b": _randn(kg, (din,))}})
    params["ups"] = ups
    start = down_dims[0]
    fb = _init_conv_block(kg, start, start, K)
    params["final"] = {"w0": fb["w"], "b0": fb["b"], "g0": fb["g"], "be0": fb["be"],
                       "wf": _randn(kg, (start, input_dim)), "bf": _randn(kg, (input_dim,))}
    return params


# ----------------------------------------------------------------------------
# Pack real params into the padded, lane-dense Pallas layout
# ----------------------------------------------------------------------------
def _pack_vec(v, cpad):
    return jnp.pad(v, (0, cpad - v.shape[-1])).reshape(1, cpad).astype(jnp.float32)


def _pack_conv_w(w, in_segs, cout_pad, dtype):
    """w: (K, cin_real_total, cout_real); in_segs: [(c_real, c_pad), ...]."""
    parts, off = [], 0
    for cr, cp in in_segs:
        blk = w[:, off:off + cr, :]
        parts.append(jnp.pad(blk, ((0, 0), (0, cp - cr), (0, 0))))
        off += cr
    wp = jnp.concatenate(parts, axis=1)
    wp = jnp.pad(wp, ((0, 0), (0, 0), (0, cout_pad - w.shape[-1])))
    return wp.astype(dtype)


def _pack_mat(w, in_segs, cout_pad, dtype):
    return _pack_conv_w(w[None], in_segs, cout_pad, dtype)[0]


def pack_resblock(prm, in_segs, cout_real, dtype):
    cp = _cpad(cout_real)
    out = {"w0": _pack_conv_w(prm["w0"], in_segs, cp, dtype),
           "b0": _pack_vec(prm["b0"], cp), "g0": _pack_vec(prm["g0"], cp),
           "be0": _pack_vec(prm["be0"], cp),
           "w1": _pack_conv_w(prm["w1"], [(cout_real, cp)], cp, dtype),
           "b1": _pack_vec(prm["b1"], cp), "g1": _pack_vec(prm["g1"], cp),
           "be1": _pack_vec(prm["be1"], cp),
           "cw": jnp.pad(prm["cw"], ((0, 0), (0, cp - cout_real))).astype(jnp.float32),
           "cb": _pack_vec(prm["cb"], cp)}
    if "rw" in prm:
        out["rw"] = _pack_mat(prm["rw"], in_segs, cp, dtype)
        out["rb"] = _pack_vec(prm["rb"], cp)
    return out


def pack_convflat(prm, c_real, dtype):
    cp = _cpad(c_real)
    Kc = prm["w"].shape[0]
    w = _pack_conv_w(prm["w"], [(c_real, cp)], cp, dtype)
    return {"w": w.reshape(Kc * cp, cp), "b": _pack_vec(prm["b"], cp)}


def pack_1x1(prm, c_real, dtype):
    cp = _cpad(c_real)
    return {"w": _pack_mat(prm["w"], [(c_real, cp)], cp, dtype), "b": _pack_vec(prm["b"], cp)}


def pack_controlnet_params(params, input_dim, down_dims, kernel_size, dtype=jnp.bfloat16):
    all_dims = [input_dim] + list(down_dims)
    in_out = list(zip(all_dims[:-1], all_dims[1:]))

    def pack_encoder(levels):
        out = []
        for (din, dout), lvl in zip(in_out, levels):
            out.append({
                "res1": pack_resblock(lvl["res1"], [(din, _cpad(din))], dout, dtype),
                "res2": pack_resblock(lvl["res2"], [(dout, _cpad(dout))], dout, dtype),
                "down": None if lvl["down"] is None else pack_convflat(lvl["down"], dout, dtype)})
        return out

    packed = {"time_mlp": dict(params["time_mlp"])}
    packed["downs"] = pack_encoder(params["downs"])
    mid_dim = all_dims[-1]
    packed["mid"] = [pack_resblock(q, [(mid_dim, _cpad(mid_dim))], mid_dim, dtype)
                     for q in params["mid"]]
    packed["copy_downs"] = pack_encoder(params["copy_downs"])
    packed["copy_mid"] = [pack_resblock(q, [(mid_dim, _cpad(mid_dim))], mid_dim, dtype)
                          for q in params["copy_mid"]]
    packed["mid_controlnet"] = pack_1x1(params["mid_controlnet"], mid_dim, dtype)
    packed["ups"] = []
    for (din, dout), lvl in zip(list(reversed(in_out[1:])), params["ups"]):
        segs = [(dout, _cpad(dout)), (dout, _cpad(dout))]
        packed["ups"].append({
            "res1": pack_resblock(lvl["res1"], segs, din, dtype),
            "res2": pack_resblock(lvl["res2"], [(din, _cpad(din))], din, dtype),
            "up": None if lvl["up"] is None else pack_convflat(lvl["up"], din, dtype)})
    start = down_dims[0]
    cps, cpi = _cpad(start), _cpad(input_dim)
    f = params["final"]
    packed["final"] = {"w0": _pack_conv_w(f["w0"], [(start, cps)], cps, dtype),
                       "b0": _pack_vec(f["b0"], cps), "g0": _pack_vec(f["g0"], cps),
                       "be0": _pack_vec(f["be0"], cps),
                       "wf": _pack_mat(f["wf"], [(start, cps)], cpi, dtype),
                       "bf": _pack_vec(f["bf"], cpi)}
    return packed


# ----------------------------------------------------------------------------
# ControlNet forward
# ----------------------------------------------------------------------------
def controlnet_forward(params, sample, timestep, global_cond=None, control_input=None, *,
                       input_dim, down_dims, dsed, n_groups=8, kernel_size=3,
                       compute_dtype=jnp.bfloat16):
    """
    sample:        (B, T, input_dim)     timestep: scalar or (B,)
    global_cond:   (B, global_cond_dim)  control_input: (B, T, input_dim) or None
    returns:       (B, T, input_dim)
    """
    # TODO(synk): local_cond / local_cond_encoder path not implemented (forward default None).
    B, T0, _ = sample.shape
    K = kernel_size
    p = K // 2
    all_dims = [input_dim] + list(down_dims)
    in_out = list(zip(all_dims[:-1], all_dims[1:]))
    mid_dim = all_dims[-1]

    timesteps = jnp.broadcast_to(jnp.asarray(timestep), (B,))
    tm = params["time_mlp"]
    emb_t = _sinusoidal_pos_emb(timesteps, dsed)
    gf = _mish_f32(jnp.dot(emb_t, tm["w1"]) + tm["b1"])
    gf = jnp.dot(gf, tm["w2"]) + tm["b2"]
    if global_cond is not None:
        gf = jnp.concatenate([gf, global_cond.astype(jnp.float32)], axis=-1)
    condm = _mish_f32(gf)                                    # shared Mish(cond), f32 (B, cond_dim)

    def film(prm):
        # per-block FiLM bias, precomputed once in XLA (tiny) and streamed per-batch
        return (jnp.dot(condm, prm["cw"]) + prm["cb"])[:, None, :]   # (B, 1, Cout_pad)

    def run_res(x_slab, prm, T, cout_real):
        return resblock_pallas(x_slab, film(prm), prm, T=T, p=p, G=n_groups,
                               cout_real=cout_real, compute_dtype=compute_dtype)

    def run_encoder(levels, x_slab, T):
        h = []
        for (din, dout), lvl in zip(in_out, levels):
            x_slab = run_res(x_slab, lvl["res1"], T, dout)
            x_slab = run_res(x_slab, lvl["res2"], T, dout)
            h.append(x_slab)
            if lvl["down"] is not None:
                x_slab, T = downsample1d_pallas(x_slab, lvl["down"], T=T, p=p,
                                                compute_dtype=compute_dtype)
        return x_slab, T, h

    Tp8_0 = _round_up(T0 + 2 * p, 8)
    cp_in = _cpad(input_dim)

    # ---- base encoder + mid ----
    xf = _to_slab(sample, p, Tp8_0, cp_in, compute_dtype)
    xf, T, h = run_encoder(params["downs"], xf, T0)
    for prm in params["mid"]:
        xf = run_res(xf, prm, T, mid_dim)

    ups_dims = list(reversed(in_out[1:]))
    if control_input is not None:
        # ---- controlnet encoder + mid ----
        xhf = _to_slab(control_input + sample, p, Tp8_0, cp_in, compute_dtype)
        xhf, Th, h_hat = run_encoder(params["copy_downs"], xhf, T0)
        for prm in params["copy_mid"]:
            xhf = run_res(xhf, prm, Th, mid_dim)
        # zero-init 1x1 conv + pad-row re-zero + add, fused in one kernel
        xf = mid_controlnet_pallas(xhf, xf, params["mid_controlnet"], T=Th, p=p,
                                   compute_dtype=compute_dtype)
        # ---- decoder with controlnet features ----
        for (din, dout), lvl in zip(ups_dims, params["ups"]):
            xf = xf + h_hat.pop()
            xf = jnp.concatenate([xf, h.pop()], axis=-1)       # channel concat (lane-dense)
            xf = run_res(xf, lvl["res1"], T, din)
            xf = run_res(xf, lvl["res2"], T, din)
            if lvl["up"] is not None:
                xf, T = upsample1d_pallas(xf, lvl["up"], T=T, p=p, compute_dtype=compute_dtype)
    else:
        # ---- plain decoder ----
        for (din, dout), lvl in zip(ups_dims, params["ups"]):
            xf = jnp.concatenate([xf, h.pop()], axis=-1)
            xf = run_res(xf, lvl["res1"], T, din)
            xf = run_res(xf, lvl["res2"], T, din)
            if lvl["up"] is not None:
                xf, T = upsample1d_pallas(xf, lvl["up"], T=T, p=p, compute_dtype=compute_dtype)

    # ---- final: Conv1dBlock + 1x1 conv (torch final_conv uses the default n_groups=8) ----
    of = final_conv_pallas(xf, params["final"], T=T, p=p, G=8, cmid_real=down_dims[0],
                           compute_dtype=compute_dtype)
    return _from_slab(of, T, p, input_dim).astype(jnp.float32)


# ----------------------------------------------------------------------------
# Pure-JAX reference for one ConditionalResidualBlock1D (self-check)
# ----------------------------------------------------------------------------
def _resblock_reference(x_btc, cond, prm, K, G, eps=1e-5):
    hp = lax.Precision.HIGHEST

    def conv_gn_mish(x, w, b, g, be):
        B, T, Cin = x.shape
        Cout = w.shape[-1]
        pp = K // 2
        xp = jnp.pad(x, ((0, 0), (pp, pp), (0, 0)))
        acc = jnp.zeros((B, T, Cout), jnp.float32) + b
        for k in range(K):
            acc = acc + jnp.einsum("btc,cd->btd", xp[:, k:k + T, :], w[k], precision=hp)
        cg = Cout // G
        a4 = acc.reshape(B, T, G, cg)
        mean = a4.mean(axis=(1, 3), keepdims=True)
        var = ((a4 - mean) ** 2).mean(axis=(1, 3), keepdims=True)
        a4 = (a4 - mean) / jnp.sqrt(var + eps)
        acc = a4.reshape(B, T, Cout) * g + be
        return _mish_f32(acc)

    out = conv_gn_mish(x_btc, prm["w0"], prm["b0"], prm["g0"], prm["be0"])
    embed = jnp.dot(_mish_f32(cond), prm["cw"], precision=hp) + prm["cb"]
    out = out + embed[:, None, :]
    out = conv_gn_mish(out, prm["w1"], prm["b1"], prm["g1"], prm["be1"])
    if "rw" in prm:
        res = jnp.einsum("btc,cd->btd", x_btc, prm["rw"], precision=hp) + prm["rb"]
    else:
        res = x_btc
    return out + res


# ----------------------------------------------------------------------------
# Main
# ----------------------------------------------------------------------------
if __name__ == "__main__":
    key = jax.random.PRNGKey(0)

    # Small shapes consistent with the module.
    B, T = 2, 16
    input_dim = 4
    down_dims = (32, 64, 128)
    dsed = 32                  # diffusion_step_embed_dim
    global_cond_dim = 16
    n_groups = 8
    kernel_size = 3
    compute_dtype = jnp.bfloat16   # bf16 storage / MXU operands; f32 accumulation + GN/Mish
    # NOTE: inter-block activations are bf16 while torch keeps f32 end-to-end; validate
    #       full-depth bf16 error against the torch model before trusting at checkpoint scale.

    k_params, k_in, k_chk = jax.random.split(key, 3)
    params_real = init_controlnet_params(k_params, input_dim, global_cond_dim, dsed,
                                         down_dims, kernel_size)
    params = pack_controlnet_params(params_real, input_dim, down_dims, kernel_size,
                                    dtype=compute_dtype)

    k1, k2, k3, k4, k5 = jax.random.split(k_in, 5)
    sample = jax.random.normal(k1, (B, T, input_dim), jnp.float32)
    global_cond = jax.random.normal(k2, (B, global_cond_dim), jnp.float32)
    control_input = jax.random.normal(k3, (B, T, input_dim), jnp.float32)
    timestep = jnp.array(7, dtype=jnp.int32)

    # --- correctness self-check: fused resblock kernel (f32, padded layout) vs pure JAX ---
    cond_dim = dsed + global_cond_dim
    p = kernel_size // 2
    chk_real = _init_resblock(_KeyGen(k_chk), input_dim, 32, cond_dim, kernel_size)
    chk_packed = pack_resblock(chk_real, [(input_dim, _cpad(input_dim))], 32, jnp.float32)
    xchk = jax.random.normal(k4, (B, T, input_dim), jnp.float32)
    cchk = jax.random.normal(k5, (B, cond_dim), jnp.float32)

    Tp8 = _round_up(T + 2 * p, 8)
    x_slab = _to_slab(xchk, p, Tp8, _cpad(input_dim), jnp.float32)
    emb_chk = (jnp.dot(_mish_f32(cchk), chk_packed["cw"], precision=lax.Precision.HIGHEST)
               + chk_packed["cb"])[:, None, :]
    got = resblock_pallas(x_slab, emb_chk, chk_packed, T=T, p=p, G=n_groups,
                          cout_real=32, compute_dtype=jnp.float32)
    got = _from_slab(got, T, p, 32)
    want = _resblock_reference(xchk, cchk, chk_real, kernel_size, n_groups)
    err = float(jnp.max(jnp.abs(got - want)))
    assert err < 5e-3, f"resblock kernel mismatch, max abs err = {err}"

    # --- full forward (jitted, controlnet branch exercised) ---
    fwd = jax.jit(controlnet_forward,
                  static_argnames=("input_dim", "down_dims", "dsed", "n_groups",
                                   "kernel_size", "compute_dtype"))
    out = fwd(params, sample, timestep, global_cond, control_input,
              input_dim=input_dim, down_dims=down_dims, dsed=dsed, n_groups=n_groups,
              kernel_size=kernel_size, compute_dtype=compute_dtype)
    out = jax.block_until_ready(out)

    assert out.shape == (B, T, input_dim), out.shape
    assert bool(jnp.all(jnp.isfinite(out)))
    print("KERNEL_OK")
</pallas_src>

<mosaic_0001>
module attributes {stable_mosaic.version = 11 : i64} {
  func.func @kernel(%arg0: i32, %arg1: memref<1x24x128xf32, #tpu.memory_space<vmem>>, %arg2: memref<3x128x128xf32, #tpu.memory_space<vmem>>, %arg3: memref<1x128xf32, #tpu.memory_space<vmem>>, %arg4: memref<1x128xf32, #tpu.memory_space<vmem>>, %arg5: memref<1x128xf32, #tpu.memory_space<vmem>>, %arg6: memref<1x1x128xf32, #tpu.memory_space<vmem>>, %arg7: memref<3x128x128xf32, #tpu.memory_space<vmem>>, %arg8: memref<1x128xf32, #tpu.memory_space<vmem>>, %arg9: memref<1x128xf32, #tpu.memory_space<vmem>>, %arg10: memref<1x128xf32, #tpu.memory_space<vmem>>, %arg11: memref<128x128xf32, #tpu.memory_space<vmem>>, %arg12: memref<1x128xf32, #tpu.memory_space<vmem>>, %arg13: memref<1x24x128xf32, #tpu.memory_space<vmem>>) attributes {dimension_semantics = [#tpu.dimension_semantics<parallel>], iteration_bounds = array<i64: 2>, scalar_prefetch = 0 : i64, scratch_operands = 0 : i64, tpu.core_type = #tpu.core_type<tc>, window_params = [{transform_indices = @transform_0, window_bounds = array<i64: 1, 24, 128>}, {pipeline_mode = #tpu.pipeline_mode<synchronous>, transform_indices = @transform_1, window_bounds = array<i64: 3, 128, 128>}, {pipeline_mode = #tpu.pipeline_mode<synchronous>, transform_indices = @transform_2, window_bounds = array<i64: 1, 128>}, {pipeline_mode = #tpu.pipeline_mode<synchronous>, transform_indices = @transform_3, window_bounds = array<i64: 1, 128>}, {pipeline_mode = #tpu.pipeline_mode<synchronous>, transform_indices = @transform_4, window_bounds = array<i64: 1, 128>}, {transform_indices = @transform_5, window_bounds = array<i64: 1, 1, 128>}, {pipeline_mode = #tpu.pipeline_mode<synchronous>, transform_indices = @transform_6, window_bounds = array<i64: 3, 128, 128>}, {pipeline_mode = #tpu.pipeline_mode<synchronous>, transform_indices = @transform_7, window_bounds = array<i64: 1, 128>}, {pipeline_mode = #tpu.pipeline_mode<synchronous>, transform_indices = @transform_8, window_bounds = array<i64: 1, 128>}, {pipeline_mode = #tpu.pipeline_mode<synchronous>, transform_indices = @transform_9, window_bounds = array<i64: 1, 128>}, {pipeline_mode = #tpu.pipeline_mode<synchronous>, transform_indices = @transform_10, window_bounds = array<i64: 128, 128>}, {pipeline_mode = #tpu.pipeline_mode<synchronous>, transform_indices = @transform_11, window_bounds = array<i64: 1, 128>}, {transform_indices = @transform_12, window_bounds = array<i64: 1, 24, 128>}]} {
    %0 = tpu.iota {dimensions = array<i32: 0>} : vector<24x1xi32>
    %c1_i32 = arith.constant 1 : i32
    %1 = vector.broadcast %c1_i32 : i32 to vector<24x1xi32>
    %2 = arith.cmpi sge, %0, %1 : vector<24x1xi32>
    %c17_i32 = arith.constant 17 : i32
    %3 = vector.broadcast %c17_i32 : i32 to vector<24x1xi32>
    %4 = arith.cmpi slt, %0, %3 : vector<24x1xi32>
    %5 = arith.andi %2, %4 : vector<24x1xi1>
    %6 = arith.extui %5 : vector<24x1xi1> to vector<24x1xi32>
    %7 = arith.sitofp %6 : vector<24x1xi32> to vector<24x1xf32>
    %8 = tpu.iota {dimensions = array<i32: 0>} : vector<128x8xi32>
    %9 = tpu.iota {dimensions = array<i32: 1>} : vector<128x8xi32>
    %c4_i32 = arith.constant 4 : i32
    %10 = vector.broadcast %c4_i32 : i32 to vector<128x8xi32>
    %11 = arith.muli %9, %10 : vector<128x8xi32>
    %12 = arith.cmpi sge, %8, %11 : vector<128x8xi32>
    %c1_i32_0 = arith.constant 1 : i32
    %13 = vector.broadcast %c1_i32_0 : i32 to vector<128x8xi32>
    %14 = arith.addi %9, %13 : vector<128x8xi32>
    %c4_i32_1 = arith.constant 4 : i32
    %15 = vector.broadcast %c4_i32_1 : i32 to vector<128x8xi32>
    %16 = arith.muli %14, %15 : vector<128x8xi32>
    %17 = arith.cmpi slt, %8, %16 : vector<128x8xi32>
    %18 = arith.andi %12, %17 : vector<128x8xi1>
    %19 = arith.extui %18 : vector<128x8xi1> to vector<128x8xi32>
    %20 = arith.sitofp %19 : vector<128x8xi32> to vector<128x8xf32>
    %21 = tpu.iota {dimensions = array<i32: 0>} : vector<8x128xi32>
    %22 = tpu.iota {dimensions = array<i32: 1>} : vector<8x128xi32>
    %c4_i32_2 = arith.constant 4 : i32
    %23 = vector.broadcast %c4_i32_2 : i32 to vector<8x128xi32>
    %24 = arith.muli %21, %23 : vector<8x128xi32>
    %25 = arith.cmpi sge, %22, %24 : vector<8x128xi32>
    %c1_i32_3 = arith.constant 1 : i32
    %26 = vector.broadcast %c1_i32_3 : i32 to vector<8x128xi32>
    %27 = arith.addi %21, %26 : vector<8x128xi32>
    %c4_i32_4 = arith.constant 4 : i32
    %28 = vector.broadcast %c4_i32_4 : i32 to vector<8x128xi32>
    %29 = arith.muli %27, %28 : vector<8x128xi32>
    %30 = arith.cmpi slt, %22, %29 : vector<8x128xi32>
    %31 = arith.andi %25, %30 : vector<8x128xi1>
    %32 = arith.extui %31 : vector<8x128xi1> to vector<8x128xi32>
    %33 = arith.sitofp %32 : vector<8x128xi32> to vector<8x128xf32>
    %c0 = arith.constant 0 : index
    %c0_5 = arith.constant 0 : index
    %c0_6 = arith.constant 0 : index
    %34 = vector.load %arg1[%c0, %c0_5, %c0_6] : memref<1x24x128xf32, #tpu.memory_space<vmem>>, vector<1x24x128xf32>
    %35 = vector.shape_cast %34 : vector<1x24x128xf32> to vector<24x128xf32>
    %cst = arith.constant 0.000000e+00 : f32
    %36 = vector.broadcast %cst : f32 to vector<1x128xf32>
    %37 = vector.extract_strided_slice %35 {offsets = [0, 0], sizes = [23, 128], strides = [1, 1]} : vector<24x128xf32> to vector<23x128xf32>
    %38 = tpu.concatenate %36, %37 in 0 : vector<1x128xf32>, vector<23x128xf32> -> vector<24x128xf32>
    %c0_7 = arith.constant 0 : index
    %c0_8 = arith.constant 0 : index
    %c0_9 = arith.constant 0 : index
    %39 = vector.load %arg2[%c0_7, %c0_8, %c0_9] : memref<3x128x128xf32, #tpu.memory_space<vmem>>, vector<1x128x128xf32>
    %40 = vector.shape_cast %39 : vector<1x128x128xf32> to vector<128x128xf32>
    %cst_10 = arith.constant dense<0.000000e+00> : vector<24x128xf32>
    %41 = tpu.matmul %38, %40, %cst_10 {dimension_numbers = #tpu.dot_dimension_numbers<[1], [0], [0], [1], [0, 0, 1, 1], [], []>} : vector<24x128xf32>, vector<128x128xf32>, vector<24x128xf32> -> vector<24x128xf32>
    %c1 = arith.constant 1 : index
    %c0_11 = arith.constant 0 : index
    %c0_12 = arith.constant 0 : index
    %42 = vector.load %arg2[%c1, %c0_11, %c0_12] : memref<3x128x128xf32, #tpu.memory_space<vmem>>, vector<1x128x128xf32>
    %43 = vector.shape_cast %42 : vector<1x128x128xf32> to vector<128x128xf32>
    %cst_13 = arith.constant dense<0.000000e+00> : vector<24x128xf32>
    %44 = tpu.matmul %35, %43, %cst_13 {dimension_numbers = #tpu.dot_dimension_numbers<[1], [0], [0], [1], [0, 0, 1, 1], [], []>} : vector<24x128xf32>, vector<128x128xf32>, vector<24x128xf32> -> vector<24x128xf32>
    %45 = arith.addf %41, %44 : vector<24x128xf32>
    %cst_14 = arith.constant 0.000000e+00 : f32
    %46 = vector.broadcast %cst_14 : f32 to vector<1x128xf32>
    %47 = vector.extract_strided_slice %35 {offsets = [1, 0], sizes = [23, 128], strides = [1, 1]} : vector<24x128xf32> to vector<23x128xf32>
    %48 = tpu.concatenate %47, %46 in 0 : vector<23x128xf32>, vector<1x128xf32> -> vector<24x128xf32>
    %c2 = arith.constant 2 : index
    %c0_15 = arith.constant 0 : index
    %c0_16 = arith.constant 0 : index
    %49 = vector.load %arg2[%c2, %c0_15, %c0_16] : memref<3x128x128xf32, #tpu.memory_space<vmem>>, vector<1x128x128xf32>
    %50 = vector.shape_cast %49 : vector<1x128x128xf32> to vector<128x128xf32>
    %cst_17 = arith.constant dense<0.000000e+00> : vector<24x128xf32>
    %51 = tpu.matmul %48, %50, %cst_17 {dimension_numbers = #tpu.dot_dimension_numbers<[1], [0], [0], [1], [0, 0, 1, 1], [], []>} : vector<24x128xf32>, vector<128x128xf32>, vector<24x128xf32> -> vector<24x128xf32>
    %52 = arith.addf %45, %51 : vector<24x128xf32>
    %c0_18 = arith.constant 0 : index
    %c0_19 = arith.constant 0 : index
    %53 = vector.load %arg3[%c0_18, %c0_19] : memref<1x128xf32, #tpu.memory_space<vmem>>, vector<1x128xf32>
    %54 = vector.broadcast %53 : vector<1x128xf32> to vector<24x128xf32>
    %55 = arith.addf %52, %54 : vector<24x128xf32>
    %c0_20 = arith.constant 0 : index
    %c0_21 = arith.constant 0 : index
    %56 = vector.load %arg4[%c0_20, %c0_21] : memref<1x128xf32, #tpu.memory_space<vmem>>, vector<1x128xf32>
    %c0_22 = arith.constant 0 : index
    %c0_23 = arith.constant 0 : index
    %57 = vector.load %arg5[%c0_22, %c0_23] : memref<1x128xf32, #tpu.memory_space<vmem>>, vector<1x128xf32>
    %58 = vector.broadcast %7 : vector<24x1xf32> to vector<24x128xf32>
    %59 = arith.mulf %55, %58 : vector<24x128xf32>
    %cst_24 = arith.constant dense<0.000000e+00> : vector<128xf32>
    %60 = vector.multi_reduction <add>, %59, %cst_24 [0] : vector<24x128xf32> to vector<128xf32>
    %61 = vector.shape_cast %60 : vector<128xf32> to vector<1x128xf32>
    %cst_25 = arith.constant dense<0.000000e+00> : vector<1x8xf32>
    %62 = tpu.matmul %61, %20, %cst_25 {dimension_numbers = #tpu.dot_dimension_numbers<[1], [0], [0], [1], [0, 0, 1, 1], [], []>} : vector<1x128xf32>, vector<128x8xf32>, vector<1x8xf32> -> vector<1x8xf32>
    %cst_26 = arith.constant 1.562500e-02 : f32
    %63 = vector.broadcast %cst_26 : f32 to vector<1x8xf32>
    %64 = arith.mulf %62, %63 : vector<1x8xf32>
    %cst_27 = arith.constant dense<0.000000e+00> : vector<1x128xf32>
    %65 = tpu.matmul %64, %33, %cst_27 {dimension_numbers = #tpu.dot_dimension_numbers<[1], [0], [0], [1], [0, 0, 1, 1], [], []>} : vector<1x8xf32>, vector<8x128xf32>, vector<1x128xf32> -> vector<1x128xf32>
    %66 = vector.broadcast %65 : vector<1x128xf32> to vector<24x128xf32>
    %67 = arith.subf %55, %66 : vector<24x128xf32>
    %68 = vector.broadcast %7 : vector<24x1xf32> to vector<24x128xf32>
    %69 = arith.mulf %67, %68 : vector<24x128xf32>
    %70 = arith.mulf %69, %69 : vector<24x128xf32>
    %cst_28 = arith.constant dense<0.000000e+00> : vector<128xf32>
    %71 = vector.multi_reduction <add>, %70, %cst_28 [0] : vector<24x128xf32> to vector<128xf32>
    %72 = vector.shape_cast %71 : vector<128xf32> to vector<1x128xf32>
    %cst_29 = arith.constant dense<0.000000e+00> : vector<1x8xf32>
    %73 = tpu.matmul %72, %20, %cst_29 {dimension_numbers = #tpu.dot_dimension_numbers<[1], [0], [0], [1], [0, 0, 1, 1], [], []>} : vector<1x128xf32>, vector<128x8xf32>, vector<1x8xf32> -> vector<1x8xf32>
    %cst_30 = arith.constant 1.562500e-02 : f32
    %74 = vector.broadcast %cst_30 : f32 to vector<1x8xf32>
    %75 = arith.mulf %73, %74 : vector<1x8xf32>
    %cst_31 = arith.constant dense<0.000000e+00> : vector<1x128xf32>
    %76 = tpu.matmul %75, %33, %cst_31 {dimension_numbers = #tpu.dot_dimension_numbers<[1], [0], [0], [1], [0, 0, 1, 1], [], []>} : vector<1x8xf32>, vector<8x128xf32>, vector<1x128xf32> -> vector<1x128xf32>
    %cst_32 = arith.constant 9.99999974E-6 : f32
    %77 = vector.broadcast %cst_32 : f32 to vector<1x128xf32>
    %78 = arith.addf %76, %77 : vector<1x128xf32>
    %79 = math.rsqrt %78 : vector<1x128xf32>
    %80 = vector.broadcast %79 : vector<1x128xf32> to vector<24x128xf32>
    %81 = arith.mulf %69, %80 : vector<24x128xf32>
    %82 = vector.broadcast %56 : vector<1x128xf32> to vector<24x128xf32>
    %83 = arith.mulf %81, %82 : vector<24x128xf32>
    %84 = vector.broadcast %57 : vector<1x128xf32> to vector<24x128xf32>
    %85 = arith.addf %83, %84 : vector<24x128xf32>
    %cst_33 = arith.constant 0.000000e+00 : f32
    %86 = vector.broadcast %cst_33 : f32 to vector<24x128xf32>
    %87 = arith.maximumf %85, %86 : vector<24x128xf32>
    %88 = vector.broadcast %cst_33 : f32 to vector<24x128xf32>
    %89 = arith.subf %85, %88 : vector<24x128xf32>
    %90 = arith.cmpf one, %89, %89 : vector<24x128xf32>
    %91 = vector.broadcast %cst_33 : f32 to vector<24x128xf32>
    %92 = arith.addf %85, %91 : vector<24x128xf32>
    %93 = math.absf %89 : vector<24x128xf32>
    %cst_34 = arith.constant 0.000000e+00 : f32
    %94 = vector.broadcast %cst_34 : f32 to vector<24x128xf32>
    %95 = arith.subf %94, %93 : vector<24x128xf32>
    %96 = math.exp %95 : vector<24x128xf32>
    %97 = math.log1p %96 : vector<24x128xf32>
    %98 = arith.addf %87, %97 : vector<24x128xf32>
    %99 = arith.select %90, %92, %98 : vector<24x128xi1>, vector<24x128xf32>
    %100 = math.tanh %99 : vector<24x128xf32>
    %101 = arith.mulf %85, %100 : vector<24x128xf32>
    %c0_35 = arith.constant 0 : index
    %c0_36 = arith.constant 0 : index
    %c0_37 = arith.constant 0 : index
    %102 = vector.load %arg6[%c0_35, %c0_36, %c0_37] : memref<1x1x128xf32, #tpu.memory_space<vmem>>, vector<1x1x128xf32>
    %103 = vector.shape_cast %102 : vector<1x1x128xf32> to vector<1x128xf32>
    %104 = vector.broadcast %103 : vector<1x128xf32> to vector<24x128xf32>
    %105 = arith.addf %101, %104 : vector<24x128xf32>
    %106 = vector.broadcast %7 : vector<24x1xf32> to vector<24x128xf32>
    %107 = arith.mulf %105, %106 : vector<24x128xf32>
    %cst_38 = arith.constant 0.000000e+00 : f32
    %108 = vector.broadcast %cst_38 : f32 to vector<1x128xf32>
    %109 = vector.extract_strided_slice %107 {offsets = [0, 0], sizes = [23, 128], strides = [1, 1]} : vector<24x128xf32> to vector<23x128xf32>
    %110 = tpu.concatenate %108, %109 in 0 : vector<1x128xf32>, vector<23x128xf32> -> vector<24x128xf32>
    %c0_39 = arith.constant 0 : index
    %c0_40 = arith.constant 0 : index
    %c0_41 = arith.constant 0 : index
    %111 = vector.load %arg7[%c0_39, %c0_40, %c0_41] : memref<3x128x128xf32, #tpu.memory_space<vmem>>, vector<1x128x128xf32>
    %112 = vector.shape_cast %111 : vector<1x128x128xf32> to vector<128x128xf32>
    %cst_42 = arith.constant dense<0.000000e+00> : vector<24x128xf32>
    %113 = tpu.matmul %110, %112, %cst_42 {dimension_numbers = #tpu.dot_dimension_numbers<[1], [0], [0], [1], [0, 0, 1, 1], [], []>} : vector<24x128xf32>, vector<128x128xf32>, vector<24x128xf32> -> vector<24x128xf32>
    %c1_43 = arith.constant 1 : index
    %c0_44 = arith.constant 0 : index
    %c0_45 = arith.constant 0 : index
    %114 = vector.load %arg7[%c1_43, %c0_44, %c0_45] : memref<3x128x128xf32, #tpu.memory_space<vmem>>, vector<1x128x128xf32>
    %115 = vector.shape_cast %114 : vector<1x128x128xf32> to vector<128x128xf32>
    %cst_46 = arith.constant dense<0.000000e+00> : vector<24x128xf32>
    %116 = tpu.matmul %107, %115, %cst_46 {dimension_numbers = #tpu.dot_dimension_numbers<[1], [0], [0], [1], [0, 0, 1, 1], [], []>} : vector<24x128xf32>, vector<128x128xf32>, vector<24x128xf32> -> vector<24x128xf32>
    %117 = arith.addf %113, %116 : vector<24x128xf32>
    %cst_47 = arith.constant 0.000000e+00 : f32
    %118 = vector.broadcast %cst_47 : f32 to vector<1x128xf32>
    %119 = vector.extract_strided_slice %107 {offsets = [1, 0], sizes = [23, 128], strides = [1, 1]} : vector<24x128xf32> to vector<23x128xf32>
    %120 = tpu.concatenate %119, %118 in 0 : vector<23x128xf32>, vector<1x128xf32> -> vector<24x128xf32>
    %c2_48 = arith.constant 2 : index
    %c0_49 = arith.constant 0 : index
    %c0_50 = arith.constant 0 : index
    %121 = vector.load %arg7[%c2_48, %c0_49, %c0_50] : memref<3x128x128xf32, #tpu.memory_space<vmem>>, vector<1x128x128xf32>
    %122 = vector.shape_cast %121 : vector<1x128x128xf32> to vector<128x128xf32>
    %cst_51 = arith.constant dense<0.000000e+00> : vector<24x128xf32>
    %123 = tpu.matmul %120, %122, %cst_51 {dimension_numbers = #tpu.dot_dimension_numbers<[1], [0], [0], [1], [0, 0, 1, 1], [], []>} : vector<24x128xf32>, vector<128x128xf32>, vector<24x128xf32> -> vector<24x128xf32>
    %124 = arith.addf %117, %123 : vector<24x128xf32>
    %c0_52 = arith.constant 0 : index
    %c0_53 = arith.constant 0 : index
    %125 = vector.load %arg8[%c0_52, %c0_53] : memref<1x128xf32, #tpu.memory_space<vmem>>, vector<1x128xf32>
    %126 = vector.broadcast %125 : vector<1x128xf32> to vector<24x128xf32>
    %127 = arith.addf %124, %126 : vector<24x128xf32>
    %c0_54 = arith.constant 0 : index
    %c0_55 = arith.constant 0 : index
    %128 = vector.load %arg9[%c0_54, %c0_55] : memref<1x128xf32, #tpu.memory_space<vmem>>, vector<1x128xf32>
    %c0_56 = arith.constant 0 : index
    %c0_57 = arith.constant 0 : index
    %129 = vector.load %arg10[%c0_56, %c0_57] : memref<1x128xf32, #tpu.memory_space<vmem>>, vector<1x128xf32>
    %130 = vector.broadcast %7 : vector<24x1xf32> to vector<24x128xf32>
    %131 = arith.mulf %127, %130 : vector<24x128xf32>
    %cst_58 = arith.constant dense<0.000000e+00> : vector<128xf32>
    %132 = vector.multi_reduction <add>, %131, %cst_58 [0] : vector<24x128xf32> to vector<128xf32>
    %133 = vector.shape_cast %132 : vector<128xf32> to vector<1x128xf32>
    %cst_59 = arith.constant dense<0.000000e+00> : vector<1x8xf32>
    %134 = tpu.matmul %133, %20, %cst_59 {dimension_numbers = #tpu.dot_dimension_numbers<[1], [0], [0], [1], [0, 0, 1, 1], [], []>} : vector<1x128xf32>, vector<128x8xf32>, vector<1x8xf32> -> vector<1x8xf32>
    %cst_60 = arith.constant 1.562500e-02 : f32
    %135 = vector.broadcast %cst_60 : f32 to vector<1x8xf32>
    %136 = arith.mulf %134, %135 : vector<1x8xf32>
    %cst_61 = arith.constant dense<0.000000e+00> : vector<1x128xf32>
    %137 = tpu.matmul %136, %33, %cst_61 {dimension_numbers = #tpu.dot_dimension_numbers<[1], [0], [0], [1], [0, 0, 1, 1], [], []>} : vector<1x8xf32>, vector<8x128xf32>, vector<1x128xf32> -> vector<1x128xf32>
    %138 = vector.broadcast %137 : vector<1x128xf32> to vector<24x128xf32>
    %139 = arith.subf %127, %138 : vector<24x128xf32>
    %140 = vector.broadcast %7 : vector<24x1xf32> to vector<24x128xf32>
    %141 = arith.mulf %139, %140 : vector<24x128xf32>
    %142 = arith.mulf %141, %141 : vector<24x128xf32>
    %cst_62 = arith.constant dense<0.000000e+00> : vector<128xf32>
    %143 = vector.multi_reduction <add>, %142, %cst_62 [0] : vector<24x128xf32> to vector<128xf32>
    %144 = vector.shape_cast %143 : vector<128xf32> to vector<1x128xf32>
    %cst_63 = arith.constant dense<0.000000e+00> : vector<1x8xf32>
    %145 = tpu.matmul %144, %20, %cst_63 {dimension_numbers = #tpu.dot_dimension_numbers<[1], [0], [0], [1], [0, 0, 1, 1], [], []>} : vector<1x128xf32>, vector<128x8xf32>, vector<1x8xf32> -> vector<1x8xf32>
    %cst_64 = arith.constant 1.562500e-02 : f32
    %146 = vector.broadcast %cst_64 : f32 to vector<1x8xf32>
    %147 = arith.mulf %145, %146 : vector<1x8xf32>
    %cst_65 = arith.constant dense<0.000000e+00> : vector<1x128xf32>
    %148 = tpu.matmul %147, %33, %cst_65 {dimension_numbers = #tpu.dot_dimension_numbers<[1], [0], [0], [1], [0, 0, 1, 1], [], []>} : vector<1x8xf32>, vector<8x128xf32>, vector<1x128xf32> -> vector<1x128xf32>
    %cst_66 = arith.constant 9.99999974E-6 : f32
    %149 = vector.broadcast %cst_66 : f32 to vector<1x128xf32>
    %150 = arith.addf %148, %149 : vector<1x128xf32>
    %151 = math.rsqrt %150 : vector<1x128xf32>
    %152 = vector.broadcast %151 : vector<1x128xf32> to vector<24x128xf32>
    %153 = arith.mulf %141, %152 : vector<24x128xf32>
    %154 = vector.broadcast %128 : vector<1x128xf32> to vector<24x128xf32>
    %155 = arith.mulf %153, %154 : vector<24x128xf32>
    %156 = vector.broadcast %129 : vector<1x128xf32> to vector<24x128xf32>
    %157 = arith.addf %155, %156 : vector<24x128xf32>
    %cst_67 = arith.constant 0.000000e+00 : f32
    %158 = vector.broadcast %cst_67 : f32 to vector<24x128xf32>
    %159 = arith.maximumf %157, %158 : vector<24x128xf32>
    %160 = vector.broadcast %cst_67 : f32 to vector<24x128xf32>
    %161 = arith.subf %157, %160 : vector<24x128xf32>
    %162 = arith.cmpf one, %161, %161 : vector<24x128xf32>
    %163 = vector.broadcast %cst_67 : f32 to vector<24x128xf32>
    %164 = arith.addf %157, %163 : vector<24x128xf32>
    %165 = math.absf %161 : vector<24x128xf32>
    %cst_68 = arith.constant 0.000000e+00 : f32
    %166 = vector.broadcast %cst_68 : f32 to vector<24x128xf32>
    %167 = arith.subf %166, %165 : vector<24x128xf32>
    %168 = math.exp %167 : vector<24x128xf32>
    %169 = math.log1p %168 : vector<24x128xf32>
    %170 = arith.addf %159, %169 : vector<24x128xf32>
    %171 = arith.select %162, %164, %170 : vector<24x128xi1>, vector<24x128xf32>
    %172 = math.tanh %171 : vector<24x128xf32>
    %173 = arith.mulf %157, %172 : vector<24x128xf32>
    %c0_69 = arith.constant 0 : index
    %c0_70 = arith.constant 0 : index
    %174 = vector.load %arg11[%c0_69, %c0_70] : memref<128x128xf32, #tpu.memory_space<vmem>>, vector<128x128xf32>
    %cst_71 = arith.constant dense<0.000000e+00> : vector<24x128xf32>
    %175 = tpu.matmul %35, %174, %cst_71 {dimension_numbers = #tpu.dot_dimension_numbers<[1], [0], [0], [1], [0, 0, 1, 1], [], []>} : vector<24x128xf32>, vector<128x128xf32>, vector<24x128xf32> -> vector<24x128xf32>
    %c0_72 = arith.constant 0 : index
    %c0_73 = arith.constant 0 : index
    %176 = vector.load %arg12[%c0_72, %c0_73] : memref<1x128xf32, #tpu.memory_space<vmem>>, vector<1x128xf32>
    %177 = vector.broadcast %176 : vector<1x128xf32> to vector<24x128xf32>
    %178 = arith.addf %175, %177 : vector<24x128xf32>
    %179 = arith.addf %173, %178 : vector<24x128xf32>
    %180 = vector.broadcast %7 : vector<24x1xf32> to vector<24x128xf32>
    %181 = arith.mulf %179, %180 : vector<24x128xf32>
    %c0_74 = arith.constant 0 : index
    %c0_75 = arith.constant 0 : index
    %c0_76 = arith.constant 0 : index
    %182 = vector.load %arg13[%c0_74, %c0_75, %c0_76] : memref<1x24x128xf32, #tpu.memory_space<vmem>>, vector<1x24x128xf32>
    %183 = vector.shape_cast %182 : vector<1x24x128xf32> to vector<24x128xf32>
    %184 = vector.shape_cast %181 : vector<24x128xf32> to vector<1x24x128xf32>
    tpu.vector_store %arg13[%c0_74, %c0_75, %c0_76], %184 {strides = array<i32>} : memref<1x24x128xf32, #tpu.memory_space<vmem>>, vector<1x24x128xf32>,
    return
  }
  func.func @transform_0(%arg0: i32) -> (i32, i32, i32) {
    %c0_i32 = arith.constant 0 : i32
    %c0_i32_0 = arith.constant 0 : i32
    %c0_i32_1 = arith.constant 0 : i32
    return %arg0, %c0_i32, %c0_i32_0 : i32, i32, i32
  }
  func.func @transform_1(%arg0: i32) -> (i32, i32, i32) {
    %c0_i32 = arith.constant 0 : i32
    %c0_i32_0 = arith.constant 0 : i32
    %c0_i32_1 = arith.constant 0 : i32
    %c0_i32_2 = arith.constant 0 : i32
    return %c0_i32, %c0_i32_0, %c0_i32_1 : i32, i32, i32
  }
  func.func @transform_2(%arg0: i32) -> (i32, i32) {
    %c0_i32 = arith.constant 0 : i32
    %c0_i32_0 = arith.constant 0 : i32
    %c0_i32_1 = arith.constant 0 : i32
    return %c0_i32, %c0_i32_0 : i32, i32
  }
  func.func @transform_3(%arg0: i32) -> (i32, i32) {
    %c0_i32 = arith.constant 0 : i32
    %c0_i32_0 = arith.constant 0 : i32
    %c0_i32_1 = arith.constant 0 : i32
    return %c0_i32, %c0_i32_0 : i32, i32
  }
  func.func @transform_4(%arg0: i32) -> (i32, i32) {
    %c0_i32 = arith.constant 0 : i32
    %c0_i32_0 = arith.constant 0 : i32
    %c0_i32_1 = arith.constant 0 : i32
    return %c0_i32, %c0_i32_0 : i32, i32
  }
  func.func @transform_5(%arg0: i32) -> (i32, i32, i32) {
    %c0_i32 = arith.constant 0 : i32
    %c0_i32_0 = arith.constant 0 : i32
    %c0_i32_1 = arith.constant 0 : i32
    return %arg0, %c0_i32, %c0_i32_0 : i32, i32, i32
  }
  func.func @transform_6(%arg0: i32) -> (i32, i32, i32) {
    %c0_i32 = arith.constant 0 : i32
    %c0_i32_0 = arith.constant 0 : i32
    %c0_i32_1 = arith.constant 0 : i32
    %c0_i32_2 = arith.constant 0 : i32
    return %c0_i32, %c0_i32_0, %c0_i32_1 : i32, i32, i32
  }
  func.func @transform_7(%arg0: i32) -> (i32, i32) {
    %c0_i32 = arith.constant 0 : i32
    %c0_i32_0 = arith.constant 0 : i32
    %c0_i32_1 = arith.constant 0 : i32
    return %c0_i32, %c0_i32_0 : i32, i32
  }
  func.func @transform_8(%arg0: i32) -> (i32, i32) {
    %c0_i32 = arith.constant 0 : i32
    %c0_i32_0 = arith.constant 0 : i32
    %c0_i32_1 = arith.constant 0 : i32
    return %c0_i32, %c0_i32_0 : i32, i32
  }
  func.func @transform_9(%arg0: i32) -> (i32, i32) {
    %c0_i32 = arith.constant 0 : i32
    %c0_i32_0 = arith.constant 0 : i32
    %c0_i32_1 = arith.constant 0 : i32
    return %c0_i32, %c0_i32_0 : i32, i32
  }
  func.func @transform_10(%arg0: i32) -> (i32, i32) {
    %c0_i32 = arith.constant 0 : i32
    %c0_i32_0 = arith.constant 0 : i32
    %c0_i32_1 = arith.constant 0 : i32
    return %c0_i32, %c0_i32_0 : i32, i32
  }
  func.func @transform_11(%arg0: i32) -> (i32, i32) {
    %c0_i32 = arith.constant 0 : i32
    %c0_i32_0 = arith.constant 0 : i32
    %c0_i32_1 = arith.constant 0 : i32
    return %c0_i32, %c0_i32_0 : i32, i32
  }
  func.func @transform_12(%arg0: i32) -> (i32, i32, i32) {
    %c0_i32 = arith.constant 0 : i32
    %c0_i32_0 = arith.constant 0 : i32
    %c0_i32_1 = arith.constant 0 : i32
    return %arg0, %c0_i32, %c0_i32_0 : i32, i32, i32
  }
}

</mosaic_0001>

<bundles_post_ra>
// kernel: tpu_custom_call.1
= control target key start
LH: loop header
LB: loop body
LE: loop exit
PB: predicated region body
PF: predicated region fallthrough
CT: control target
= control target key end

     0   :  { %s4613_s0 = inlined_call_operand.hbm [shape: f32[2,24,128], index: 0, kind: input, shape index: {}]   ;;  %s4614_s1 = inlined_call_operand.hbm [shape: f32[3,128,128], index: 1, kind: input, shape index: {}]   ;;  %s4615_s2 = inlined_call_operand.vmem [shape: f32[1,128], index: 2, kind: input, shape index: {}]   ;;  %s4616_s3 = inlined_call_operand.vmem [shape: f32[1,128], index: 3, kind: input, shape index: {}]   ;;  %s4617_s4 = inlined_call_operand.vmem [shape: f32[1,128], index: 4, kind: input, shape index: {}]   ;;  %s4618_s5 = inlined_call_operand.vmem [shape: f32[2,1,128], index: 5, kind: input, shape index: {}]   ;;  %s4619_s6 = inlined_call_operand.hbm [shape: f32[3,128,128], index: 6, kind: input, shape index: {}]   ;;  %s4620_s7 = inlined_call_operand.vmem [shape: f32[1,128], index: 7, kind: input, shape index: {}]   ;;  %s4621_s8 = inlined_call_operand.vmem [shape: f32[1,128], index: 8, kind: input, shape index: {}]   ;;  %s4622_s9 = inlined_call_operand.vmem [shape: f32[1,128], index: 9, kind: input, shape index: {}]   ;;  %s4623_s10 = inlined_call_operand.hbm [shape: f32[128,128], index: 10, kind: input, shape index: {}]   ;;  %s4624_s11 = inlined_call_operand.vmem [shape: f32[1,128], index: 11, kind: input, shape index: {}]   ;;  %s4625_s12 = inlined_call_operand.hbm [shape: f32[2,24,128], index: 12, kind: output, shape index: {}]  }
   0x1   :  { %4636 = sst [smem:[#allocation17_spill]] %s4621_s8 }
   0x2   :  { %4637 = sst [smem:[#allocation18_spill]] %s4622_s9 }
   0x3   :  { %4638 = sst [smem:[#allocation19_spill]] %s4624_s11 }
   0x4   :  { %4639 = sst [smem:[#allocation20_spill]] %s4625_s12 }
   0x5   :  { %17 = vsyncpa [#allocation3], 0 }
   0x6   :  { %19 = vsyncpa [#allocation3 + $0x1], 0 }
   0x7   :  { %20 = vsyncpa [#allocation6], 0 }
   0x8   :  { %21 = vsyncpa [#allocation9], 0 }
   0x9   :  { %22 = vsyncpa [#allocation4], 0 }
   0xa   :  { %24 = vsyncpa [#allocation4 + $0x1], 0  ;;  %s3776_s21 = smov 0   ;;  %s3778_s22 = smov 0  }
   0xb   :  { %s3780_s23 = smov 0   ;;  %s3782_s24 = smov 0  }
   0xc LB: > { %4640 = sst [smem:[#allocation15_spill]] %s3683_s21  ;;  %s3797_s25 = sadd.s32 4294967295, %s3695_s24   ;;  %s3695_s24 = sphi %s3782_s24, %s4695_s24   ;;  %s3691_s23 = sphi %s3780_s23, %s4694_s23   ;;  %s3687_s22 = sphi %s3778_s22, %s4693_s22   ;;  %s3683_s21 = sphi %s3776_s21, %s4692_s21  }
   0xd   : > { %s2335_s26 = sadd.s32 4294967294, %s3695_s24   ;;  %p50_p0 = scmp.ne.s32.totalorder %s3687_s22, %s3683_s21 }
   0xe   : > { %p4628_p1 = scmp.eq.s32.totalorder %s3797_s25, 0  ;;  %p316_p3 = scmp.eq.s32.totalorder %s2335_s26, 1 }
   0xf   : > { %p2336_p5 = scmp.ge.s32.totalorder %s3695_s24, 1  ;;  %p323_p7 = scmp.lt.s32.totalorder %s3695_s24, 3 }
  0x10   : > { %p3806_p4 = por %p4628_p1, %p50_p0  ;;  %p3811_p6 = por %p316_p3, %p50_p0 }
  0x11   : > { %p3816_p8 = pnand %p2336_p5, %p323_p7  ;;  %s3697_s30 = smov [#allocation5]  }
  0x12   : > { %s4641_s27 = scalar_select %p3806_p4, 1, 0 }
  0x13   : > { %s4642_s28 = scalar_select %p3811_p6, 1, 0 }
  0x14   : > { %s4644_s29 = scalar_select %p3816_p8, 1, 0 }
  0x15   : > { %4643 = sst [smem:[#allocation16_spill]] %s4642_s28  ;;  %s335_s13 = sshll.u32 %s3697_s30, 4  ;;  %s3820_s13 = int_to_ptr.vmem [resolvable:$true] %s335_s13 }
  0x16   : > { %p3394_p9 = pneg %p3816_p8  ;;  %s3698_s15 = smov [#allocation7]  }
  0x17   : > { %s357_s16 = sshll.u32 %s3698_s15, 4  ;;  %s3699_s17 = smov [#allocation8]   ;;  %s3831_s16 = int_to_ptr.vmem [resolvable:$true] %s357_s16 }
  0x18   : > { %p3827_p11 = pnand %p3394_p9, %p4628_p1  ;;  %s3833_s18 = sshll.u32 %s3699_s17, 4  ;;  %s380_s18 = int_to_ptr.vmem [resolvable:$true] %s3833_s18 }
  0x19   : > { %s3507_s26 = scalar_lea.hbm %s4614_s1, 6144 }
  0x1a   : > { %p3508_p12 = scmp.ne.s32.totalorder %s4614_s1, %s3507_s26  ;;  %p3843_p13 = pneg %p3827_p11 }
  0x1b   : > { %p3514_p5 = scmp.lt.u32.totalorder %s3507_s26, %s4614_s1 }
  0x1c   : > { %p3510_p0 = pnand %p3843_p13, %p3508_p12 }
  0x1e   : > { %p3511_p3 = pneg %p3510_p0 }
  0x20   : > { %p3516_p7 = pnand %p3514_p5, %p3511_p3 }
  0x22   : > { %3519 = shalt.err (!%p3516_p7)
}
  0x23   : > { %s3520_s28 = scalar_lea.vmem %s3820_s13, 6144  ;;  %p3528_p2 = scmp.lt.s32.totalorder %s3820_s13, %s3820_s13 }
  0x24   : > { %p3521_p9 = scmp.ne.s32.totalorder %s3820_s13, %s3520_s28  ;;  %p3529_p6 = scmp.lt.s32.totalorder %s3520_s28, %s3520_s28 }
  0x26   : > { %p3523_p10 = pnand %p3521_p9, %p3843_p13  ;;  %p3530_p12 = por %p3529_p6, %p3528_p2 }
  0x28   : > { %p3524_p1 = pneg %p3523_p10 }
  0x2a   : > { %p3531_p0 = pnand %p3530_p12, %p3524_p1 }
  0x2c   : > { %3534 = shalt.err (!%p3531_p0)
}
  0x2d   : > { %s4632_s19 = smov 128   ;;  %s4633_s20 = smov 8  }
  0x2e   : > { %3397 = dma.hbm_to_vmem [thread:$0]  (!%p3827_p11), %s4614_s1, 6144, %s3820_s13, [#allocation6], %s4632_s19, %s4632_s19, %s4633_s20  }
  0x2f   : > { %s3535_s28 = scalar_lea.hbm %s4619_s6, 6144 }
  0x30   : > { %p3536_p1 = scmp.ne.s32.totalorder %s4619_s6, %s3535_s28  ;;  %p3542_p10 = scmp.lt.u32.totalorder %s3535_s28, %s4619_s6 }
  0x32   : > { %p3538_p2 = pnand %p3536_p1, %p3843_p13 }
  0x34   : > { %p3539_p6 = pneg %p3538_p2 }
  0x36   : > { %p3544_p3 = pnand %p3542_p10, %p3539_p6 }
  0x38   : > { %3547 = shalt.err (!%p3544_p3)
}
  0x39   : > { %s3548_s13 = scalar_lea.vmem %s3831_s16, 6144  ;;  %p3556_p12 = scmp.lt.s32.totalorder %s3831_s16, %s3831_s16 }
  0x3a   : > { %p3549_p5 = scmp.ne.s32.totalorder %s3831_s16, %s3548_s13  ;;  %p3557_p0 = scmp.lt.s32.totalorder %s3548_s13, %s3548_s13 }
  0x3c   : > { %p3551_p7 = pnand %p3549_p5, %p3843_p13  ;;  %p3558_p1 = por %p3557_p0, %p3556_p12 }
  0x3e   : > { %p3552_p9 = pneg %p3551_p7 }
  0x40   : > { %p3559_p2 = pnand %p3558_p1, %p3552_p9 }
  0x42   : > { %3562 = shalt.err (!%p3559_p2)
}
  0x43   : > { %3400 = dma.hbm_to_vmem [thread:$0]  (!%p3827_p11), %s4619_s6, 6144, %s3831_s16, [#allocation6], %s4632_s19, %s4632_s19, %s4633_s20  }
  0x44   : > { %s3563_s26 = scalar_lea.hbm %s4623_s10, 2048 }
  0x45   : > { %p3564_p6 = scmp.ne.s32.totalorder %s4623_s10, %s3563_s26  ;;  %p3570_p5 = scmp.lt.u32.totalorder %s3563_s26, %s4623_s10 }
  0x47   : > { %p3566_p10 = pnand %p3564_p6, %p3843_p13 }
  0x49   : > { %p3567_p3 = pneg %p3566_p10 }
  0x4b   : > { %p3572_p7 = pnand %p3570_p5, %p3567_p3 }
  0x4d   : > { %3575 = shalt.err (!%p3572_p7)
}
  0x4e   : > { %s3576_s13 = scalar_lea.vmem %s380_s18, 2048  ;;  %p3584_p1 = scmp.lt.s32.totalorder %s380_s18, %s380_s18 }
  0x4f   : > { %p3577_p9 = scmp.ne.s32.totalorder %s380_s18, %s3576_s13  ;;  %p3585_p2 = scmp.lt.s32.totalorder %s3576_s13, %s3576_s13 }
  0x51   : > { %p3579_p12 = pnand %p3577_p9, %p3843_p13  ;;  %p3586_p4 = por %p3585_p2, %p3584_p1 }
  0x53   : > { %p3580_p0 = pneg %p3579_p12 }
  0x55   : > { %p3587_p8 = pnand %p3586_p4, %p3580_p0 }
  0x57   : > { %3590 = shalt.err (!%p3587_p8)
}
  0x58   : > { %3403 = dma.hbm_to_vmem [thread:$0]  (!%p3827_p11), %s4623_s10, 2048, %s380_s18, [#allocation9], %s4632_s19, %s4632_s19, %s4633_s20  }
  0x59   : > { %s3916_s21 = sadd.s32 1, %s3695_s24   ;;  %s37_s9 = sadd.s32 1, %s3691_s23 }
  0x5a   : > { %s34_s14 = ssub.s32 %s3695_s24, %s3916_s21  ;;  %p44_p8 = scmp.ne.s32.totalorder %s3691_s23, %s3687_s22 }
  0x5b   : > { %p35_p4 = scmp.eq.s32.totalorder %s34_s14, 0  ;;  %p45_p13 = scmp.eq.s32.totalorder %s3695_s24, 0 }
  0x5c   : > { %p3415_p6 = scmp.lt.s32.totalorder %s3695_s24, 2  ;;  %p4647_p3 = scmp.eq.s32.totalorder %s3797_s25, 1 }
  0x5d   : > { %s3926_s11 = scalar_select %p35_p4, %s3691_s23, %s37_s9  }
  0x5e   : > { %p46_p10 = por %p45_p13, %p44_p8  ;;  %p3930_p5 = por %p4647_p3, %p44_p8 }
  0x5f   : > { %s396_s26 = sand.u32 1, %s3691_s23   ;;  %s3375_s30 = smul.u32 384, %s3695_s24 }
  0x60   : > { %s3374_s18 = smul.u32 24, %s396_s26  ;;  %p3936_p11 = pnand %p3415_p6, %p46_p10 }
  0x61   : > { %s3943_s13 = scalar_lea.hbm %s4613_s0, %s3375_s30  ;;  %s3947_s14 = scalar_lea.sflag [#allocation3], %s396_s26 }
  0x62   : > { %s400_s16 = scalar_lea.vmem [#allocation2], %s3374_s18  ;;  %s3591_s9 = scalar_lea.hbm %s3943_s13, 384 }
  0x63   : > { %s407_s8 = sshll.u32 %s400_s16, 4  ;;  %p3592_p7 = scmp.ne.s32.totalorder %s3943_s13, %s3591_s9  ;;  %s3945_s8 = int_to_ptr.vmem [resolvable:$true] %s407_s8 }
  0x64   : > { %p3593_p9 = pneg %p3936_p11  ;;  %s3596_s28 = scalar_lea.hbm %s4613_s0, 768 }
  0x65   : > { %p3597_p1 = scmp.lt.u32.totalorder %s3943_s13, %s4613_s0  ;;  %p3598_p2 = scmp.lt.u32.totalorder %s3596_s28, %s3591_s9 }
  0x66   : > { %p3594_p12 = pnand %p3593_p9, %p3592_p7  ;;  %p3600_p8 = scmp.lt.u32.totalorder %s3591_s9, %s3943_s13 }
  0x67   : > { %p3599_p4 = por %p3598_p2, %p3597_p1 }
  0x68   : > { %p3595_p0 = pneg %p3594_p12 }
  0x69   : > { %p3601_p13 = por %p3600_p8, %p3599_p4 }
  0x6b   : > { %p3602_p6 = pnand %p3601_p13, %p3595_p0 }
  0x6d   : > { %3605 = shalt.err (!%p3602_p6)
}
  0x6e   : > { %s3606_s26 = scalar_lea.vmem %s3945_s8, 384  ;;  %s3702_s18 = smov [#allocation2]  }
  0x6f   : > { %p3607_p10 = scmp.ne.s32.totalorder %s3945_s8, %s3606_s26  ;;  %s3611_s16 = sshll.u32 %s3702_s18, 4  ;;  %s3612_s16 = int_to_ptr.vmem [resolvable:$false] %s3611_s16 }
  0x70   : > { %s3613_s19 = scalar_lea.vmem %s3612_s16, 768  ;;  %p3614_p12 = scmp.lt.s32.totalorder %s3945_s8, %s3612_s16 }
  0x71   : > { %p3609_p3 = pnand %p3607_p10, %p3593_p9  ;;  %p3615_p1 = scmp.lt.s32.totalorder %s3613_s19, %s3606_s26 }
  0x73   : > { %p3610_p7 = pneg %p3609_p3  ;;  %p3616_p2 = por %p3615_p1, %p3614_p12 }
  0x75   : > { %p3617_p4 = pnand %p3616_p2, %p3610_p7 }
  0x77   : > { %3620 = shalt.err (!%p3617_p4)
}
  0x78   : > { %s4650_s20 = smov 8   ;;  %s4651_s9 = smov 128  }
  0x79   : > { %3407 = dma.hbm_to_vmem [thread:$0]  (!%p3936_p11), %s3943_s13, 384, %s3945_s8, %s3947_s14, %s4651_s9, %s4651_s9, %s4650_s20  }
  0x7a   : > { %p4652_p9 = scmp.ne.s32.totalorder %s4644_s29, 0 }
  0x7b   : > { %s3981_s30 = sand.u32 (!%p4652_p9), 1, %s3687_s22   ;;  %p4653_p0 = scmp.ne.s32.totalorder (!%p4652_p9), %s4641_s27, 0 }
  0x7c   : > { %425 = sbr.rel (%p4652_p9) target bundleno = 2635 (0xa4b), region = 68  ;;  %s428_s28 = scalar_lea.sflag (!%p4652_p9), [#allocation3], %s3981_s30 }
  0x7d   : > { %s3376_s17 = smul.u32 (!%p4652_p9), 24, %s3981_s30 }
  0x7f   : > { %s3987_s15 = scalar_lea.vmem (!%p4652_p9), [#allocation2], %s3376_s17 }
  0x83   : > { %3666 = dma.done.wait (%p4653_p0), %s428_s28, 384  }
  0x84   : > { %3668 = vsyncadd (%p4653_p0), %s428_s28, 4294966912  ;;  %p4654_p11 = scmp.eq.s32.totalorder %s3797_s25, 0 }
  0x86   : > { %3670 = dma.done.wait (%p4654_p11), [#allocation6], 12288   ;;  %p4655_p8 = pmov %p4654_p11 }
  0x88   : > { %3672 = vsyncadd (%p4655_p8), [#allocation6], 4294955008  ;;  %p4656_p13 = pmov %p4655_p8 }
  0x89   : > { %p4657_p6 = pmov %p4655_p8 }
  0x8a   : > { %3674 = dma.done.wait (%p4656_p13), [#allocation9], 2048  }
  0x8b   : > { %3676 = vsyncadd (%p4657_p6), [#allocation9], 4294965248  ;;  %v3703_v0 = vmov 0.0|0.0   ;;  %vm3704_vm0 = vmmov 0   ;;  %v3705_v1 = vmov 0.0   ;;  %v648_v2 = vld [vmem:[#allocation5 + $0x80] sm:$0xff] }
  0x8c   : > { %3110 = vmatprep.subr.bf16.mxu0 %v3703_v0  ;;  %3134 = vmatprep.subr.bf16.mxu1 %v3703_v0  ;;  %v649_v3 = vld [vmem:[#allocation5 + $0x88] sm:$0xff]  ;;  %v631_v4 = vld [vmem:[#allocation5] sm:$0xff]  ;;  %v650_v7 = vld [vmem:[#allocation5 + $0x90] sm:$0xff]  ;;  %vm4635_vm1 = vcmask 1040384   ;;  %vm4634_vm3 = vcmask 1046528   ;;  %p487_p10 = scmp.lt.s32.totalorder %s3797_s25, 1 }
  0x8d   : > { %2695 = vmatprep.mubr.msk.f32.mxu0 %vm3704_vm0, %v3705_v1  ;;  %2736 = vmatprep.mubr.msk.f32.mxu1 %vm3704_vm0, %v3705_v1  ;;  %v3111_v5 = vpack.c.bf16 %v649_v3, %v648_v2  ;;  %v632_v6 = vld [vmem:[#allocation5 + $0x8] sm:$0xff]  ;;  %v651_v8 = vld [vmem:[#allocation5 + $0x98] sm:$0xff]  ;;  %v633_v10 = vld [vmem:[#allocation5 + $0x10] sm:$0xff]  ;;  %s4683_s29 = sld [smem:[#allocation17_spill]]  ;;  %s4684_s14 = sld [smem:[#allocation18_spill]] }
  0x8e   : > { %v3135_v9 = vpack.c.bf16 %v632_v6, %v631_v4  ;;  %v634_v11 = vld [vmem:[#allocation5 + $0x18] sm:$0xff]  ;;  %v3114_v12 = vpack.c.bf16 %v651_v8, %v650_v7  ;;  %v652_v14 = vld [vmem:[#allocation5 + $0xa0] sm:$0xff]  ;;  %v653_v15 = vld [vmem:[#allocation5 + $0xa8] sm:$0xff]  ;;  %s488_s18 = scalar_select %p487_p10, %s3797_s25, 1 }
  0x8f   : > { %3112 = vmatpush3.bf16.msra.mxu0 %v3111_v5  ;;  %v3138_v13 = vpack.c.bf16 %v634_v11, %v633_v10  ;;  %v635_v16 = vld [vmem:[#allocation5 + $0x20] sm:$0xff]  ;;  %v636_v17 = vld [vmem:[#allocation5 + $0x28] sm:$0xff]  ;;  %v3117_v18 = vpack.c.bf16 %v653_v15, %v652_v14  ;;  %v654_v20 = vld [vmem:[#allocation5 + $0xb0] sm:$0xff]  ;;  %s4685_s16 = sld [smem:[#allocation19_spill]]  ;;  %s486_s19 = scalar_lea.vmem [#allocation10], %s3376_s17 }
  0x90   : > { %3136 = vmatpush3.bf16.msra.mxu1 %v3135_v9  ;;  %3113 = vmatprep.subr.bf16.mxu0 %v3703_v0  ;;  %v3141_v19 = vpack.c.bf16 %v636_v17, %v635_v16  ;;  %v655_v21 = vld [vmem:[#allocation5 + $0xb8] sm:$0xff]  ;;  %v637_v22 = vld [vmem:[#allocation5 + $0x30] sm:$0xff]  ;;  %v656_v26 = vld [vmem:[#allocation5 + $0xc0] sm:$0xff]  ;;  %s489_s20 = scalar_lea.vmem %s4618_s5, %s488_s18  ;;  %s3377_s9 = smul.u32 384, %s3797_s25 }
  0x91   : > { %3137 = vmatprep.subr.bf16.mxu1 %v3703_v0  ;;  %v638_v23 = vld [vmem:[#allocation5 + $0x38] sm:$0xff]  ;;  %v3120_v24 = vpack.c.bf16 %v655_v21, %v654_v20  ;;  %v657_v27 = vld [vmem:[#allocation5 + $0xc8] sm:$0xff]  ;;  %v639_v28 = vld [vmem:[#allocation5 + $0x40] sm:$0xff]  ;;  %s2211_s25 = scalar_lea.sflag [#allocation4], %s3981_s30  ;;  %s3708_s13 = smov [#allocation10]  }
  0x92   : > { %v3144_v25 = vpack.c.bf16 %v638_v23, %v637_v22  ;;  %v640_v29 = vld [vmem:[#allocation5 + $0x48] sm:$0xff]  ;;  %v3123_v30 = vpack.c.bf16 %v657_v27, %v656_v26  ;;  %v658_v32 = vld [vmem:[#allocation5 + $0xd0] sm:$0xff]  ;;  %v659_v33 = vld [vmem:[#allocation5 + $0xd8] sm:$0xff]  ;;  %v490_v26 = vlaneseq  ;;  %s3625_s8 = sshll.u32 %s3708_s13, 4  ;;  %s3626_s8 = int_to_ptr.vmem [resolvable:$false] %s3625_s8 }
  0x93   : > { %3115 = vmatpush3.bf16.msra.mxu0 %v3114_v12  ;;  %v3147_v31 = vpack.c.bf16 %v640_v29, %v639_v28  ;;  %v641_v34 = vld [vmem:[#allocation5 + $0x50] sm:$0xff]  ;;  %v642_v35 = vld [vmem:[#allocation5 + $0x58] sm:$0xff]  ;;  %v3126_v36 = vpack.c.bf16 %v659_v33, %v658_v32  ;;  %v660_v38 = vld [vmem:[#allocation5 + $0xe0] sm:$0xff] }
  0x94   : > { %3139 = vmatpush3.bf16.msra.mxu1 %v3138_v13  ;;  %3116 = vmatprep.subr.bf16.mxu0 %v3703_v0  ;;  %v3150_v37 = vpack.c.bf16 %v642_v35, %v641_v34  ;;  %v661_v39 = vld [vmem:[#allocation5 + $0xe8] sm:$0xff]  ;;  %v643_v40 = vld [vmem:[#allocation5 + $0x60] sm:$0xff]  ;;  %v662_v44 = vld [vmem:[#allocation5 + $0xf0] sm:$0xff]  ;;  %v4079_v27 = vshrl.u32 %v490_v26, 7  ;;  %v4081_v28 = vand.u32 127, %v490_v26 }
  0x95   : > { %3140 = vmatprep.subr.bf16.mxu1 %v3703_v0  ;;  %v644_v41 = vld [vmem:[#allocation5 + $0x68] sm:$0xff]  ;;  %v3129_v42 = vpack.c.bf16 %v661_v39, %v660_v38  ;;  %v663_v45 = vld [vmem:[#allocation5 + $0xf8] sm:$0xff]  ;;  %v645_v46 = vld [vmem:[#allocation5 + $0x70] sm:$0xff]  ;;  %v3706_v34 = vmov 1.0|1.0  }
  0x96   : > { %v3153_v43 = vpack.c.bf16 %v644_v41, %v643_v40  ;;  %v646_v47 = vld [vmem:[#allocation5 + $0x78] sm:$0xff]  ;;  %v3132_v48 = vpack.c.bf16 %v663_v45, %v662_v44  ;;  %v4021_v50 = vld [vmem:[%s3987_s15] sm:$0xff]  ;;  %v835_v51 = vld [vmem:[#allocation5 + $0x100] sm:$0xff]  ;;  %v492_v29 = vadd.s32 8, %v4079_v27  ;;  %v4109_v35 = vadd.s32 16, %v4079_v27 }
  0x97   : > { %3118 = vmatpush3.bf16.msra.mxu0 %v3117_v18  ;;  %v3156_v49 = vpack.c.bf16 %v646_v47, %v645_v46  ;;  %v836_v52 = vld [vmem:[#allocation5 + $0x108] sm:$0xff]  ;;  %v4025_v53 = vld [vmem:[%s3987_s15 + $0x8] sm:$0xff]  ;;  %v622_v54 = vrot.slane %v4021_v50, 7  ;;  %vm4030_vm2 = vmneg %vm4635_vm1  ;;  %v825_v20 = vrot.slane %v4021_v50, 1  ;;  %v511_v38 = vadd.s32 40, %v4079_v27 }
  0x98   : > { %3142 = vmatpush3.bf16.msra.mxu1 %v3141_v19  ;;  %3119 = vmatprep.subr.bf16.mxu0 %v3703_v0  ;;  %v3159_v55 = vpack.c.bf16 %v836_v52, %v835_v51  ;;  %v837_v57 = vld [vmem:[#allocation5 + $0x110] sm:$0xff]  ;;  %v838_v58 = vld [vmem:[#allocation5 + $0x118] sm:$0xff]  ;;  %v623_v59 = vrot.slane %v4025_v53, 7  ;;  %v839_v62 = vld [vmem:[#allocation5 + $0x120] sm:$0xff]  ;;  %v826_v21 = vrot.slane %v4025_v53, 1  ;;  %v512_v40 = vadd.s32 48, %v4079_v27 }
  0x99   : > { %3143 = vmatprep.subr.bf16.mxu1 %v3703_v0  ;;  %v4036_v60 = vld [vmem:[%s3987_s15 + $0x10] sm:$0xff]  ;;  %v3162_v61 = vpack.c.bf16 %v838_v58, %v837_v57  ;;  %v840_v63 = vld [vmem:[#allocation5 + $0x128] sm:$0xff]  ;;  %v841_v5 = vld [vmem:[#allocation5 + $0x130] sm:$0xff]  ;;  %v513_v41 = vadd.s32 56, %v4079_v27  ;;  %v515_v44 = vadd.s32 72, %v4079_v27  ;;  %v516_v46 = vadd.s32 80, %v4079_v27 }
  0x9a   : > { %v624_v2 = vsel %vm4635_vm1, %v622_v54, %v623_v59  ;;  %v625_v3 = vrot.slane %v4036_v60, 7  ;;  %v3165_v4 = vpack.c.bf16 %v840_v63, %v839_v62  ;;  %v842_v6 = vld [vmem:[#allocation5 + $0x138] sm:$0xff]  ;;  %v843_v9 = vld [vmem:[#allocation5 + $0x140] sm:$0xff]  ;;  %v844_v10 = vld [vmem:[#allocation5 + $0x148] sm:$0xff]  ;;  %v827_v23 = vsel %vm4634_vm3, %v825_v20, %v826_v21 }
  0x9b   : > { %3121 = vmatpush3.bf16.msra.mxu0 %v3120_v24  ;;  %v3168_v8 = vpack.c.bf16 %v842_v6, %v841_v5  ;;  %v3171_v11 = vpack.c.bf16 %v844_v10, %v843_v9  ;;  %v845_v12 = vld [vmem:[#allocation5 + $0x150] sm:$0xff]  ;;  %v846_v13 = vld [vmem:[#allocation5 + $0x158] sm:$0xff]  ;;  %v847_v15 = vld [vmem:[#allocation5 + $0x160] sm:$0xff]  ;;  %v828_v24 = vrot.slane %v4036_v60, 1  ;;  %v517_v47 = vadd.s32 88, %v4079_v27 }
  0x9c   : > { %3145 = vmatpush3.bf16.msra.mxu1 %v3144_v25  ;;  %3122 = vmatprep.subr.bf16.mxu0 %v3703_v0  ;;  %v626_v7 = vsel %vm4635_vm1, %v623_v59, %v625_v3  ;;  %v3174_v14 = vpack.c.bf16 %v846_v13, %v845_v12  ;;  %v848_v16 = vld [vmem:[#allocation5 + $0x168] sm:$0xff]  ;;  %v849_v18 = vld [vmem:[#allocation5 + $0x170] sm:$0xff]  ;;  %v850_v19 = vld [vmem:[#allocation5 + $0x178] sm:$0xff]  ;;  %v520_v52 = vadd.s32 112, %v4079_v27 }
  0x9d   : > { %3146 = vmatprep.subr.bf16.mxu1 %v3703_v0  ;;  %v3177_v17 = vpack.c.bf16 %v848_v16, %v847_v15  ;;  %v3180_v22 = vpack.c.bf16 %v850_v19, %v849_v18  ;;  %v829_v25 = vsel %vm4634_vm3, %v826_v21, %v828_v24  ;;  %v2368_v13 = vld [vmem:[%s4615_s2] ss:$0 sm:$0xff] }
  0x9f   : > { %3124 = vmatpush3.bf16.msra.mxu0 %v3123_v30  ;;  %v4085_v30 = vmul.u32 4, %v4081_v28 }
  0xa0   : > { %3148 = vmatpush3.bf16.msra.mxu1 %v3147_v31  ;;  %3125 = vmatprep.subr.bf16.mxu0 %v3703_v0  ;;  %v541_v31 = vadd.s32 1, %v4081_v28 }
  0xa1   : > { %3149 = vmatprep.subr.bf16.mxu1 %v3703_v0  ;;  %vm525_vm4 = vcmp.ge.s32.totalorder %v4079_v27, %v4085_v30  ;;  %vm526_vm5 = vcmp.ge.s32.totalorder %v492_v29, %v4085_v30  ;;  %vm527_vm11 = vcmp.ge.s32.totalorder %v4109_v35, %v4085_v30 }
  0xa2   : > { %v4090_v32 = vmul.u32 4, %v541_v31  ;;  %v609_v31 = vadd.s32 1, %v4079_v27 }
  0xa3   : > { %3127 = vmatpush3.bf16.msra.mxu0 %v3126_v36  ;;  %v509_v36 = vadd.s32 24, %v4079_v27 }
  0xa4   : > { %3151 = vmatpush3.bf16.msra.mxu1 %v3150_v37  ;;  %3128 = vmatprep.subr.bf16.mxu0 %v3703_v0  ;;  %vm543_vm6 = vcmp.lt.s32.totalorder %v4079_v27, %v4090_v32  ;;  %vm544_vm7 = vcmp.lt.s32.totalorder %v492_v29, %v4090_v32  ;;  %vm545_vm13 = vcmp.lt.s32.totalorder %v4109_v35, %v4090_v32  ;;  %v510_v37 = vadd.s32 32, %v4079_v27 }
  0xa5   : > { %3152 = vmatprep.subr.bf16.mxu1 %v3703_v0  ;;  %vm559_vm8 = vmand %vm525_vm4, %vm543_vm6  ;;  %vm528_vm12 = vcmp.ge.s32.totalorder %v509_v36, %v4085_v30  ;;  %vm546_vm14 = vcmp.lt.s32.totalorder %v509_v36, %v4090_v32  ;;  %v607_v36 = vmul.u32 4, %v4079_v27 }
  0xa6   : > { %vm560_vm9 = vmand %vm526_vm5, %vm544_vm7  ;;  %vm529_vm6 = vcmp.ge.s32.totalorder %v510_v37, %v4085_v30  ;;  %vm530_vm7 = vcmp.ge.s32.totalorder %v511_v38, %v4085_v30 }
  0xa7   : > { %3130 = vmatpush3.bf16.msra.mxu0 %v3129_v42  ;;  %vm4096_vm10 = vmpackc.low %vm560_vm9, %vm559_vm8  ;;  %vm547_vm8 = vcmp.lt.s32.totalorder %v510_v37, %v4090_v32  ;;  %vm548_vm9 = vcmp.lt.s32.totalorder %v511_v38, %v4090_v32  ;;  %v610_v37 = vmul.u32 4, %v609_v31  ;;  %v1400_v31 = vld [vmem:[#allocation7 + $0xa8] sm:$0xff] }
  0xa8   : > { %3154 = vmatpush3.bf16.msra.mxu1 %v3153_v43  ;;  %3131 = vmatprep.subr.bf16.mxu0 %v3703_v0  ;;  %vm561_vm15 = vmand %vm527_vm11, %vm545_vm13  ;;  %v514_v43 = vadd.s32 64, %v4079_v27 }
  0xa9   : > { %3155 = vmatprep.subr.bf16.mxu1 %v3703_v0  ;;  %vm562_vm4 = vmand %vm528_vm12, %vm546_vm14  ;;  %vm531_vm14 = vcmp.ge.s32.totalorder %v512_v40, %v4085_v30 }
  0xaa   : > { %vm4120_vm5 = vmpackc.low %vm562_vm4, %vm561_vm15  ;;  %vm532_vm15 = vcmp.ge.s32.totalorder %v513_v41, %v4085_v30  ;;  %vm549_vm4 = vcmp.lt.s32.totalorder %v512_v40, %v4090_v32 }
  0xab   : > { %3133 = vmatpush3.bf16.msra.mxu0 %v3132_v48  ;;  %vm563_vm11 = vmand %vm529_vm6, %vm547_vm8  ;;  %vm550_vm6 = vcmp.lt.s32.totalorder %v513_v41, %v4090_v32 }
  0xac   : > { %3157 = vmatpush3.bf16.msra.mxu1 %v3156_v49  ;;  %3158 = vmatprep.subr.bf16.mxu0 %v3703_v0  ;;  %vm564_vm12 = vmand %vm530_vm7, %vm548_vm9  ;;  %v518_v49 = vadd.s32 96, %v4079_v27 }
  0xad   : > { %3182 = vmatprep.subr.bf16.mxu1 %v3703_v0  ;;  %vm4138_vm13 = vmpackc.low %vm564_vm12, %vm563_vm11  ;;  %vm533_vm11 = vcmp.ge.s32.totalorder %v514_v43, %v4085_v30  ;;  %vm534_vm12 = vcmp.ge.s32.totalorder %v515_v44, %v4085_v30 }
  0xae   : > { %2696 = vmatmul.mubr.f32.vlgmr.msra.gmra.mrb[0].mxu0 %v4021_v50  ;;  %vm565_vm7 = vmand %vm531_vm14, %vm549_vm4  ;;  %vm551_vm14 = vcmp.lt.s32.totalorder %v514_v43, %v4090_v32  ;;  %v519_v50 = vadd.s32 104, %v4079_v27 }
  0xaf   : > { %2737 = vmatmul.mubr.msk.f32.vlgmr.msra.gmra.mrb[0].mxu1 %vm4030_vm2, %v622_v54  ;;  %3160 = vmatpush3.bf16.msra.mxu0 %v3159_v55  ;;  %vm566_vm8 = vmand %vm532_vm15, %vm550_vm6  ;;  %vm552_vm15 = vcmp.lt.s32.totalorder %v515_v44, %v4090_v32  ;;  %v2104_v44 = vld [vmem:[#allocation8 + $0x30] sm:$0xff] }
  0xb0   : > { %3161 = vmatprep.subr.bf16.mxu0 %v3703_v0  ;;  %2698 = vmatprep.mubr.msk.f32.mxu0 %vm3704_vm0, %v3705_v1  ;;  %vm4156_vm9 = vmpackc.low %vm566_vm8, %vm565_vm7  ;;  %vm535_vm8 = vcmp.ge.s32.totalorder %v516_v46, %v4085_v30 }
  0xb1   : > { %2739 = vmatprep.mubr.msk.f32.mxu1 %vm3704_vm0, %v3705_v1  ;;  %3184 = vmatpush3.bf16.msk.msra.mxu1 %vm4096_vm10, %v3706_v34  ;;  %vm567_vm4 = vmand %vm533_vm11, %vm551_vm14  ;;  %vm536_vm11 = vcmp.ge.s32.totalorder %v517_v47, %v4085_v30  ;;  %vm554_vm14 = vcmp.lt.s32.totalorder %v517_v47, %v4090_v32 }
  0xb2   : > { %2699 = vmatmul.mubr.f32.gmra.mrb[2].mxu0 %v4025_v53  ;;  %3185 = vmatprep.subr.bf16.mxu1 %v3703_v0  ;;  %vm568_vm6 = vmand %vm534_vm12, %vm552_vm15  ;;  %vm553_vm12 = vcmp.lt.s32.totalorder %v516_v46, %v4090_v32  ;;  %v521_v53 = vadd.s32 120, %v4079_v27  ;;  %v3707_v46 = vmov 1.0  }
  0xb3   : > { %3163 = vmatpush3.bf16.msra.mxu0 %v3162_v61  ;;  %2740 = vmatmul.mubr.f32.gmra.mrb[2].mxu1 %v624_v2  ;;  %vm4174_vm7 = vmpackc.low %vm568_vm6, %vm567_vm4 }
  0xb4   : > { %3164 = vmatprep.subr.bf16.mxu0 %v3703_v0  ;;  %2701 = vmatprep.mubr.msk.f32.mxu0 %vm3704_vm0, %v3705_v1  ;;  %vm569_vm15 = vmand %vm535_vm8, %vm553_vm12  ;;  %vm537_vm8 = vcmp.ge.s32.totalorder %v518_v49, %v4085_v30  ;;  %vm538_vm12 = vcmp.ge.s32.totalorder %v519_v50, %v4085_v30 }
  0xb5   : > { %2742 = vmatprep.mubr.msk.f32.mxu1 %vm3704_vm0, %v3705_v1  ;;  %3187 = vmatpush3.bf16.msk.msra.mxu1 %vm4120_vm5, %v3706_v34  ;;  %vm570_vm4 = vmand %vm536_vm11, %vm554_vm14  ;;  %vm555_vm11 = vcmp.lt.s32.totalorder %v518_v49, %v4090_v32  ;;  %vm556_vm14 = vcmp.lt.s32.totalorder %v519_v50, %v4090_v32  ;;  %v4273_v50 = vsub.s32 0, %v4079_v27 }
  0xb6   : > { %2702 = vmatmul.mubr.f32.gmra.mrb[4].mxu0 %v4036_v60  ;;  %3188 = vmatprep.subr.bf16.mxu1 %v3703_v0  ;;  %vm4192_vm6 = vmpackc.low %vm570_vm4, %vm569_vm15 }
  0xb7   : > { %3166 = vmatpush3.bf16.msra.mxu0 %v3165_v4  ;;  %2743 = vmatmul.mubr.f32.gmra.mrb[4].mxu1 %v626_v7  ;;  %vm572_vm15 = vmand %vm538_vm12, %vm556_vm14  ;;  %vm557_vm12 = vcmp.lt.s32.totalorder %v520_v52, %v4090_v32  ;;  %vm558_vm14 = vcmp.lt.s32.totalorder %v521_v53, %v4090_v32 }
  0xb8   : > { %3167 = vmatprep.subr.bf16.mxu0 %v3703_v0  ;;  %2777 = vmatprep.mubr.msk.f32.mxu0 %vm3704_vm0, %v3705_v1 }
  0xb9   : > { %2818 = vmatprep.mubr.msk.f32.mxu1 %vm3704_vm0, %v3705_v1  ;;  %3190 = vmatpush3.bf16.msk.msra.mxu1 %vm4138_vm13, %v3706_v34 }
  0xba   : > { %3191 = vmatprep.subr.bf16.mxu1 %v3703_v0 }
  0xbb   : > { %3169 = vmatpush3.bf16.msra.mxu0 %v3168_v8 }
  0xbc   : > { %3170 = vmatprep.subr.bf16.mxu0 %v3703_v0 }
  0xbd   : > { %3193 = vmatpush3.bf16.msk.msra.mxu1 %vm4156_vm9, %v3706_v34 }
  0xbe   : > { %3194 = vmatprep.subr.bf16.mxu1 %v3703_v0 }
  0xbf   : > { %3172 = vmatpush3.bf16.msra.mxu0 %v3171_v11 }
  0xc0   : > { %3173 = vmatprep.subr.bf16.mxu0 %v3703_v0 }
  0xc1   : > { %3196 = vmatpush3.bf16.msk.msra.mxu1 %vm4174_vm7, %v3706_v34 }
  0xc2   : > { %3197 = vmatprep.subr.bf16.mxu1 %v3703_v0 }
  0xc3   : > { %3175 = vmatpush3.bf16.msra.mxu0 %v3174_v14 }
  0xc4   : > { %3176 = vmatprep.subr.bf16.mxu0 %v3703_v0 }
  0xc5   : > { %3199 = vmatpush3.bf16.msk.msra.mxu1 %vm4192_vm6, %v3706_v34 }
  0xc6   : > { %3200 = vmatprep.subr.bf16.mxu1 %v3703_v0 }
  0xc7   : > { %3178 = vmatpush3.bf16.msra.mxu0 %v3177_v17 }
  0xc8   : > { %3179 = vmatprep.subr.bf16.mxu0 %v3703_v0 }
  0xcb   : > { %3181 = vmatpush3.bf16.msra.mxu0 %v3180_v22 }
  0xcc   : > { %3206 = vmatprep.subr.bf16.mxu0 %v3703_v0 }
  0xce   : > { %2778 = vmatmul.mubr.f32.vlgmr.msra.gmra.mrb[6].mxu0 %v827_v23 }
  0xcf   : > { %2780 = vmatprep.mubr.msk.f32.mxu0 %vm3704_vm0, %v3705_v1  ;;  %3208 = vmatpush3.bf16.msk.msra.mxu0 %vm4096_vm10, %v3706_v34 }
  0xd0   : > { %3209 = vmatprep.subr.bf16.mxu0 %v3703_v0 }
  0xd2   : > { %2781 = vmatmul.mubr.f32.gmra.mrb[8].mxu0 %v829_v25 }
  0xd3   : > { %2783 = vmatprep.mubr.msk.f32.mxu0 %vm3704_vm0, %v3705_v1  ;;  %3211 = vmatpush3.bf16.msk.msra.mxu0 %vm4120_vm5, %v3706_v34 }
  0xd4   : > { %3212 = vmatprep.subr.bf16.mxu0 %v3703_v0 }
  0xd6   : > { %2784 = vmatmul.mubr.msk.f32.gmra.mrb[10].mxu0 %vm4634_vm3, %v828_v24  ;;  %vm571_vm3 = vmand %vm537_vm8, %vm555_vm11  ;;  %vm539_vm8 = vcmp.ge.s32.totalorder %v520_v52, %v4085_v30  ;;  %vm540_vm11 = vcmp.ge.s32.totalorder %v521_v53, %v4085_v30 }
  0xd7   : > { %2858 = vmatprep.mubr.msk.f32.mxu0 %vm3704_vm0, %v3705_v1  ;;  %3214 = vmatpush3.bf16.msk.msra.mxu0 %vm4138_vm13, %v3706_v34  ;;  %vm4210_vm4 = vmpackc.low %vm572_vm15, %vm571_vm3 }
  0xd8   : > { %3215 = vmatprep.subr.bf16.mxu0 %v3703_v0  ;;  %3202 = vmatpush3.bf16.msk.msra.mxu1 %vm4210_vm4, %v3706_v34  ;;  %vm573_vm1 = vmand %vm539_vm8, %vm557_vm12  ;;  %vm499_vm8 = vcmp.lt.s32.totalorder %v4109_v35, 17  ;;  %vm611_vm12 = vcmp.lt.s32.totalorder %v4081_v28, %v610_v37 }
  0xd9   : > { %3203 = vmatprep.subr.bf16.mxu1 %v3703_v0  ;;  %vm574_vm3 = vmand %vm540_vm11, %vm558_vm14  ;;  %v4247_v23 = vsel %vm499_vm8, 1.0, %v3705_v1  ;;  %vm608_vm11 = vcmp.ge.s32.totalorder %v4081_v28, %v607_v36 }
  0xda   : > { %vm4226_vm15 = vmpackc.low %vm574_vm3, %vm573_vm1  ;;  %vm494_vm1 = vcmp.ge.s32.totalorder %v4079_v27, 1  ;;  %vm1028_vm3 = vcmask 64512  }
  0xdb   : > { %3217 = vmatpush3.bf16.msk.msra.mxu0 %vm4156_vm9, %v3706_v34  ;;  %v4244_v18 = vsel %vm494_vm1, 1.0, %v3705_v1  ;;  %vm4255_vm14 = vmand %vm608_vm11, %vm611_vm12 }
  0xdc   : > { %3218 = vmatprep.subr.bf16.mxu0 %v3703_v0  ;;  %3205 = vmatpush3.bf16.msk.msra.mxu1 %vm4226_vm15, %v3706_v34 }
  0xdd   : > { %2821 = vmatprep.subr.mxu1 %v3705_v1 }
  0xdf   : > { %3220 = vmatpush3.bf16.msk.msra.mxu0 %vm4174_vm7, %v3706_v34 }
  0xe0   : > { %3221 = vmatprep.subr.bf16.mxu0 %v3703_v0 }
  0xe3   : > { %3223 = vmatpush3.bf16.msk.msra.mxu0 %vm4192_vm6, %v3706_v34 }
  0xe4   : > { %3224 = vmatprep.subr.bf16.mxu0 %v3703_v0 }
  0xe7   : > { %3226 = vmatpush3.bf16.msk.msra.mxu0 %vm4210_vm4, %v3706_v34 }
  0xe8   : > { %3227 = vmatprep.subr.bf16.mxu0 %v3703_v0 }
  0xeb   : > { %3229 = vmatpush3.bf16.msk.msra.mxu0 %vm4226_vm15, %v3706_v34 }
  0xec   : > { %3254 = vmatprep.subr.bf16.mxu0 %v3703_v0 }
 0x181   : > { %v730_v57 = vpop.f32.mrb[0].mxu0 }
 0x182   : > { %v2697_v58 = vpop.f32.mrb[1].mxu0  ;;  %v810_v59 = vpop.f32.mrb[0].mxu1 }
 0x183   : > { %v811_v60 = vadd.f32 %v810_v59, %v730_v57  ;;  %v2738_v61 = vpop.f32.mrb[1].mxu1 }
 0x185   : > { %v735_v62 = vpop.f32.mrb[2].mxu0 }
 0x186   : > { %v2700_v63 = vpop.f32.mrb[3].mxu0  ;;  %v815_v2 = vpop.f32.mrb[2].mxu1 }
 0x187   : > { %v816_v3 = vadd.f32 %v815_v2, %v735_v62  ;;  %v2741_v4 = vpop.f32.mrb[3].mxu1 }
 0x189   : > { %v740_v5 = vpop.f32.mrb[4].mxu0 }
 0x18a   : > { %v2703_v6 = vpop.f32.mrb[5].mxu0  ;;  %v820_v7 = vpop.f32.mrb[4].mxu1 }
 0x18b   : > { %v821_v8 = vadd.f32 %v820_v7, %v740_v5  ;;  %v2744_v9 = vpop.f32.mrb[5].mxu1 }
 0x1a1   : > { %v917_v10 = vpop.f32.mrb[6].mxu0 }
 0x1a2   : > { %v931_v11 = vadd.f32 %v917_v10, %v811_v60  ;;  %v2779_v12 = vpop.f32.mrb[7].mxu0 }
 0x1a4   : > { %v941_v17 = vadd.f32 %v2368_v13, %v931_v11 }
 0x1a5   : > { %v922_v14 = vpop.f32.mrb[8].mxu0 }
 0x1a6   : > { %v932_v15 = vadd.f32 %v922_v14, %v816_v3  ;;  %v2782_v16 = vpop.f32.mrb[9].mxu0  ;;  %v946_v24 = vmul.f32 %v4244_v18, %v941_v17  ;;  %v1395_v14 = vld [vmem:[#allocation7 + $0x80] sm:$0xff] }
 0x1a7   : > { %v1378_v16 = vld [vmem:[#allocation7] sm:$0xff] }
 0x1a8   : > { %v942_v20 = vadd.f32 %v2368_v13, %v932_v15  ;;  %v1396_v15 = vld [vmem:[#allocation7 + $0x88] sm:$0xff] }
 0x1a9   : > { %v927_v19 = vpop.f32.mrb[10].mxu0 }
 0x1aa   : > { %v933_v21 = vadd.f32 %v927_v19, %v821_v8  ;;  %v2785_v22 = vpop.f32.mrb[11].mxu0  ;;  %v949_v26 = vadd.f32 %v946_v24, %v942_v20  ;;  %v1379_v19 = vld [vmem:[#allocation7 + $0x8] sm:$0xff]  ;;  %v1380_v24 = vld [vmem:[#allocation7 + $0x10] sm:$0xff] }
 0x1ab   : > { %v3255_v22 = vpack.c.bf16 %v1379_v19, %v1378_v16 }
 0x1ac   : > { %v943_v25 = vadd.f32 %v2368_v13, %v933_v21  ;;  %v1398_v21 = vld [vmem:[#allocation7 + $0x98] sm:$0xff] }
 0x1ae   : > { %v948_v29 = vmul.f32 %v4247_v23, %v943_v25 }
 0x1b0   : > { %v950_v30 = vadd.f32 %v949_v26, %v948_v29 }
 0x1b2   : > { %v951_v32 = vrot.slane %v950_v30, 4 }
 0x1b4   : > { %v952_v35 = vadd.f32 %v951_v32, %v950_v30  ;;  %v1399_v30 = vld [vmem:[#allocation7 + $0xa0] sm:$0xff] }
 0x1b5   : > { %v1382_v32 = vld [vmem:[#allocation7 + $0x20] sm:$0xff]  ;;  %v3237_v36 = vpack.c.bf16 %v1400_v31, %v1399_v30  ;;  %v2406_v31 = vld [vmem:[%s4617_s4] ss:$0 sm:$0xff] }
 0x1b6   : > { %v953_v38 = vrot.slane %v952_v35, 2 }
 0x1b8   : > { %v954_v40 = vadd.f32 %v953_v38, %v952_v35  ;;  %v1383_v35 = vld [vmem:[#allocation7 + $0x28] sm:$0xff]  ;;  %v1401_v38 = vld [vmem:[#allocation7 + $0xb0] sm:$0xff] }
 0x1b9   : > { %v3261_v37 = vpack.c.bf16 %v1383_v35, %v1382_v32 }
 0x1ba   : > { %v955_v41 = vrot.slane %v954_v40, 1 }
 0x1bc   : > { %v956_v43 = vadd.f32 %v955_v41, %v954_v40  ;;  %v1402_v40 = vld [vmem:[#allocation7 + $0xb8] sm:$0xff]  ;;  %v1384_v41 = vld [vmem:[#allocation7 + $0x30] sm:$0xff] }
 0x1be   : > { %2819 = vmatmul.mubr.f32.vlgmr.msra.gmra.mrb[6].mxu1 %v956_v43  ;;  %v1385_v43 = vld [vmem:[#allocation7 + $0x38] sm:$0xff] }
 0x1bf   : > { %2822 = vmatpush3.msk.msra.mxu1 %vm4255_vm14, %v3707_v46  ;;  %2823 = vmatprep.mubr.msk.f32.mxu1 %vm3704_vm0, %v3705_v1 }
 0x1c0   : > { %2861 = vmatprep.subr.mxu1 %v3705_v1 }
 0x291   : > { %v1023_v47 = vpop.f32.mrb[6].mxu1 }
 0x292   : > { %v1027_v28 = vmul.f32 0.015625, %v1023_v47  ;;  %v2820_v49 = vpop.f32.mrb[7].mxu1  ;;  %v3240_v47 = vpack.c.bf16 %v1402_v40, %v1401_v38 }
 0x293   : > { %v1403_v49 = vld [vmem:[#allocation7 + $0xc0] sm:$0xff] }
 0x294   : > { %2824 = vmatmul.mubr.msk.f32.vlgmr.msra.gmra.mrb[8].mxu1 %vm1028_vm3, %v1027_v28  ;;  %v3264_v28 = vpack.c.bf16 %v1385_v43, %v1384_v41 }
 0x295   : > { %2862 = vmatpush3.msk.msra.mxu1 %vm4255_vm14, %v3707_v46  ;;  %2863 = vmatprep.mubr.msk.f32.mxu1 %vm3704_vm0, %v3705_v1 }
 0x296   : > { %3230 = vmatprep.subr.bf16.mxu1 %v3703_v0 }
 0x367   : > { %v1098_v52 = vpop.f32.mrb[8].mxu1 }
 0x368   : > { %v1105_v53 = vrot.slane %v1098_v52, %v4273_v50  ;;  %v2825_v57 = vpop.f32.mrb[9].mxu1  ;;  %v1404_v52 = vld [vmem:[#allocation7 + $0xc8] sm:$0xff] }
 0x369   : > { %v1387_v57 = vld [vmem:[#allocation7 + $0x48] sm:$0xff] }
 0x36a   : > { %v1106_v58 = vsub.f32 %v941_v17, %v1105_v53  ;;  %v4276_v59 = vsub.f32 %v942_v20, %v1105_v53  ;;  %v1108_v60 = vsub.f32 %v943_v25, %v1105_v53  ;;  %v3231_v17 = vpack.c.bf16 %v1396_v15, %v1395_v14  ;;  %v1397_v20 = vld [vmem:[#allocation7 + $0x90] sm:$0xff]  ;;  %v1381_v25 = vld [vmem:[#allocation7 + $0x18] sm:$0xff]  ;;  %v1386_v53 = vld [vmem:[#allocation7 + $0x40] sm:$0xff] }
 0x36b   : > { %v3234_v26 = vpack.c.bf16 %v1398_v21, %v1397_v20  ;;  %v3258_v29 = vpack.c.bf16 %v1381_v25, %v1380_v24  ;;  %v1392_v14 = vld [vmem:[#allocation7 + $0x70] sm:$0xff]  ;;  %v1393_v15 = vld [vmem:[#allocation7 + $0x78] sm:$0xff] }
 0x36c   : > { %v4279_v61 = vmul.f32 %v4244_v18, %v1106_v58  ;;  %v4282_v62 = vmul.f32 %v4247_v23, %v1108_v60  ;;  %v1113_v27 = vmul.f32 %v4276_v59, %v4276_v59  ;;  %v3243_v58 = vpack.c.bf16 %v1404_v52, %v1403_v49  ;;  %v2405_v25 = vld [vmem:[%s4616_s3] ss:$0 sm:$0xff] }
 0x36d   : > { %v3267_v60 = vpack.c.bf16 %v1387_v57, %v1386_v53 }
 0x36e   : > { %v1112_v63 = vmul.f32 %v4279_v61, %v4279_v61  ;;  %v1114_v2 = vmul.f32 %v4282_v62, %v4282_v62 }
 0x370   : > { %v1115_v3 = vadd.f32 %v1113_v27, %v1112_v63  ;;  %v1405_v63 = vld [vmem:[#allocation7 + $0xd0] sm:$0xff]  ;;  %v1406_v27 = vld [vmem:[#allocation7 + $0xd8] sm:$0xff] }
 0x372   : > { %v1116_v4 = vadd.f32 %v1115_v3, %v1114_v2  ;;  %v1388_v2 = vld [vmem:[#allocation7 + $0x50] sm:$0xff]  ;;  %v1389_v3 = vld [vmem:[#allocation7 + $0x58] sm:$0xff] }
 0x374   : > { %v1117_v5 = vrot.slane %v1116_v4, 4 }
 0x376   : > { %v1118_v6 = vadd.f32 %v1117_v5, %v1116_v4  ;;  %v3246_v4 = vpack.c.bf16 %v1406_v27, %v1405_v63  ;;  %v3270_v5 = vpack.c.bf16 %v1389_v3, %v1388_v2 }
 0x378   : > { %v1119_v7 = vrot.slane %v1118_v6, 2 }
 0x37a   : > { %v1120_v8 = vadd.f32 %v1119_v7, %v1118_v6  ;;  %v1407_v6 = vld [vmem:[#allocation7 + $0xe0] sm:$0xff]  ;;  %v1408_v7 = vld [vmem:[#allocation7 + $0xe8] sm:$0xff] }
 0x37c   : > { %v1121_v9 = vrot.slane %v1120_v8, 1 }
 0x37e   : > { %v1122_v10 = vadd.f32 %v1121_v9, %v1120_v8  ;;  %v1390_v8 = vld [vmem:[#allocation7 + $0x60] sm:$0xff]  ;;  %v1391_v9 = vld [vmem:[#allocation7 + $0x68] sm:$0xff] }
 0x380   : > { %2859 = vmatmul.mubr.f32.vlgmr.msra.gmra.mrb[12].mxu0 %v1122_v10  ;;  %v3249_v10 = vpack.c.bf16 %v1408_v7, %v1407_v6 }
 0x381   : > { %2939 = vmatprep.mubr.msk.f32.mxu0 %vm3704_vm0, %v3705_v1  ;;  %3256 = vmatpush3.bf16.msra.mxu0 %v3255_v22 }
 0x382   : > { %3257 = vmatprep.subr.bf16.mxu0 %v3703_v0 }
 0x385   : > { %3259 = vmatpush3.bf16.msra.mxu0 %v3258_v29 }
 0x386   : > { %3260 = vmatprep.subr.bf16.mxu0 %v3703_v0 }
 0x389   : > { %3262 = vmatpush3.bf16.msra.mxu0 %v3261_v37 }
 0x38a   : > { %3263 = vmatprep.subr.bf16.mxu0 %v3703_v0 }
 0x38d   : > { %3265 = vmatpush3.bf16.msra.mxu0 %v3264_v28 }
 0x38e   : > { %3266 = vmatprep.subr.bf16.mxu0 %v3703_v0 }
 0x391   : > { %3268 = vmatpush3.bf16.msra.mxu0 %v3267_v60 }
 0x392   : > { %3269 = vmatprep.subr.bf16.mxu0 %v3703_v0 }
 0x395   : > { %3271 = vmatpush3.bf16.msra.mxu0 %v3270_v5 }
 0x396   : > { %3272 = vmatprep.subr.bf16.mxu0 %v3703_v0 }
 0x453   : > { %v1189_v11 = vpop.f32.mrb[12].mxu0 }
 0x454   : > { %v1193_v12 = vmul.f32 0.015625, %v1189_v11  ;;  %v2860_v13 = vpop.f32.mrb[13].mxu0  ;;  %v3273_v11 = vpack.c.bf16 %v1391_v9, %v1390_v8 }
 0x455   : > { %v1410_v13 = vld [vmem:[#allocation7 + $0xf8] sm:$0xff] }
 0x456   : > { %2864 = vmatmul.mubr.msk.f32.vlgmr.msra.gmra.mrb[10].mxu1 %vm1028_vm3, %v1193_v12  ;;  %v1409_v12 = vld [vmem:[#allocation7 + $0xf0] sm:$0xff]  ;;  %3274 = vmatpush3.bf16.msra.mxu0 %v3273_v11 }
 0x457   : > { %2898 = vmatprep.mubr.msk.f32.mxu1 %vm3704_vm0, %v3705_v1  ;;  %3232 = vmatpush3.bf16.msra.mxu1 %v3231_v17  ;;  %v3252_v16 = vpack.c.bf16 %v1410_v13, %v1409_v12  ;;  %v3276_v17 = vpack.c.bf16 %v1393_v15, %v1392_v14 }
 0x458   : > { %3233 = vmatprep.subr.bf16.mxu1 %v3703_v0  ;;  %3275 = vmatprep.subr.bf16.mxu0 %v3703_v0 }
 0x45a   : > { %3277 = vmatpush3.bf16.msra.mxu0 %v3276_v17 }
 0x45b   : > { %3235 = vmatpush3.bf16.msra.mxu1 %v3234_v26  ;;  %3302 = vmatprep.subr.bf16.mxu0 %v3703_v0 }
 0x45c   : > { %3236 = vmatprep.subr.bf16.mxu1 %v3703_v0 }
 0x45f   : > { %3238 = vmatpush3.bf16.msra.mxu1 %v3237_v36 }
 0x460   : > { %3239 = vmatprep.subr.bf16.mxu1 %v3703_v0 }
 0x463   : > { %3241 = vmatpush3.bf16.msra.mxu1 %v3240_v47 }
 0x464   : > { %3242 = vmatprep.subr.bf16.mxu1 %v3703_v0 }
 0x467   : > { %3244 = vmatpush3.bf16.msra.mxu1 %v3243_v58 }
 0x468   : > { %3245 = vmatprep.subr.bf16.mxu1 %v3703_v0 }
 0x46b   : > { %3247 = vmatpush3.bf16.msra.mxu1 %v3246_v4 }
 0x46c   : > { %3248 = vmatprep.subr.bf16.mxu1 %v3703_v0 }
 0x46f   : > { %3250 = vmatpush3.bf16.msra.mxu1 %v3249_v10 }
 0x470   : > { %3251 = vmatprep.subr.bf16.mxu1 %v3703_v0 }
 0x473   : > { %3253 = vmatpush3.bf16.msra.mxu1 %v3252_v16 }
 0x474   : > { %3278 = vmatprep.subr.bf16.mxu1 %v3703_v0 }
 0x529   : > { %v1263_v19 = vpop.f32.mrb[10].mxu1 }
 0x52a   : > { %v1264_v20 = vadd.f32 1e-05, %v1263_v19  ;;  %v2865_v21 = vpop.f32.mrb[11].mxu1 }
 0x52c   : > { %3464 = vrsqrt.f32 %v1264_v20 }
 0x536   : > { %v3465_v22 = vpop.eup %3464 }
 0x537   : > { %v1271_v24 = vrot.slane %v3465_v22, %v4273_v50 }
 0x539   : > { %v1272_v26 = vmul.f32 %v1271_v24, %v4279_v61  ;;  %v1273_v29 = vmul.f32 %v1271_v24, %v4276_v59  ;;  %v1274_v30 = vmul.f32 %v1271_v24, %v4282_v62 }
 0x53b   : > { %v1281_v32 = vmul.f32 %v2405_v25, %v1272_v26  ;;  %v1282_v35 = vmul.f32 %v2405_v25, %v1273_v29  ;;  %v1283_v36 = vmul.f32 %v2405_v25, %v1274_v30 }
 0x53d   : > { %v4321_v37 = vadd.f32 %v2406_v31, %v1281_v32  ;;  %v4323_v38 = vadd.f32 %v2406_v31, %v1282_v35  ;;  %v4325_v40 = vadd.f32 %v2406_v31, %v1283_v36 }
 0x53f   : > { %v1302_v41 = vand.u32 2147483647, %v4321_v37  ;;  %v1303_v61 = vand.u32 2147483647, %v4323_v38  ;;  %v1304_v62 = vand.u32 2147483647, %v4325_v40  ;;  %vm1296_vm12 = vcmp.ne.f32.partialorder %v4321_v37, %v4321_v37 }
 0x540   : > { %v1293_v13 = vmax.f32 %v4321_v37, 0.0  ;;  %v1294_v17 = vmax.f32 %v4323_v38, 0.0  ;;  %v1295_v29 = vmax.f32 %v4325_v40, 0.0 }
 0x541   : > { %v1305_v59 = vsub.f32 0.0, %v1302_v41  ;;  %v1306_v43 = vsub.f32 0.0, %v1303_v61  ;;  %v1307_v28 = vsub.f32 0.0, %v1304_v62 }
 0x543   : > { %v1308_v47 = vmul.f32 1.442695, %v1305_v59  ;;  %v1310_v49 = vmul.f32 1.442695, %v1306_v43  ;;  %v1312_v52 = vmul.f32 1.442695, %v1307_v28 }
 0x544   : > { %v2407_v59 = vld [vmem:[%s489_s20] ss:$0 sm:$0xff]  ;;  %v1582_v28 = vld [vmem:[#allocation7 + $0x108] sm:$0xff]  ;;  %s2224_s20 = sshll.u32 %s486_s19, 4  ;;  %s4563_s20 = int_to_ptr.vmem [resolvable:$true] %s2224_s20 }
 0x545   : > { %3466 = vpow2.f32 %v1308_v47  ;;  %v1581_v47 = vld [vmem:[#allocation7 + $0x100] sm:$0xff]  ;;  %p3628_p1 = scmp.lt.s32.totalorder %s4563_s20, %s3626_s8 }
 0x546   : > { %3468 = vpow2.f32 %v1310_v49 }
 0x547   : > { %3470 = vpow2.f32 %v1312_v52 }
 0x54f   : > { %v3467_v53 = vpop.eup %3466 }
 0x550   : > { %v3469_v57 = vpop.eup %3468  ;;  %v1314_v58 = vadd.f32 1.0, %v3467_v53  ;;  %v1317_v2 = vmul.f32 -0.5, %v3467_v53  ;;  %v1320_v6 = vand.u32 2147483647, %v3467_v53 }
 0x551   : > { %v3471_v60 = vpop.eup %3470  ;;  %v1323_v63 = vadd.f32 1.0, %v3469_v57  ;;  %v1326_v3 = vmul.f32 -0.5, %v3469_v57  ;;  %v1329_v8 = vand.u32 2147483647, %v3469_v57 }
 0x552   : > { %3472 = vlog2.f32 %v1314_v58  ;;  %v1332_v27 = vadd.f32 1.0, %v3471_v60  ;;  %v1335_v4 = vmul.f32 -0.5, %v3471_v60  ;;  %v1318_v5 = vadd.f32 1.0, %v1317_v2 }
 0x553   : > { %3474 = vlog2.f32 %v1323_v63  ;;  %v1327_v7 = vadd.f32 1.0, %v1326_v3  ;;  %v1338_v11 = vand.u32 2147483647, %v3471_v60  ;;  %vm1321_vm1 = vcmp.lt.f32.partialorder %v1320_v6, 0.0004427343  ;;  %v1583_v63 = vld [vmem:[#allocation7 + $0x110] sm:$0xff] }
 0x554   : > { %3476 = vlog2.f32 %v1332_v27  ;;  %v1336_v9 = vadd.f32 1.0, %v1335_v4  ;;  %v1319_v15 = vmul.f32 %v3467_v53, %v1318_v5  ;;  %vm1330_vm8 = vcmp.lt.f32.partialorder %v1329_v8, 0.0004427343  ;;  %v1584_v27 = vld [vmem:[#allocation7 + $0x118] sm:$0xff]  ;;  %v1585_v4 = vld [vmem:[#allocation7 + $0x120] sm:$0xff]  ;;  %v1586_v5 = vld [vmem:[#allocation7 + $0x128] sm:$0xff] }
 0x555   : > { %v1328_v20 = vmul.f32 %v3469_v57, %v1327_v7  ;;  %vm1339_vm11 = vcmp.lt.f32.partialorder %v1338_v11, 0.0004427343  ;;  %v3279_v58 = vpack.c.bf16 %v1582_v28, %v1581_v47  ;;  %v3285_v7 = vpack.c.bf16 %v1586_v5, %v1585_v4 }
 0x556   : > { %v1337_v24 = vmul.f32 %v3471_v60, %v1336_v9  ;;  %v1587_v9 = vld [vmem:[#allocation7 + $0x130] sm:$0xff] }
 0x55c   : > { %v3473_v10 = vpop.eup %3472 }
 0x55d   : > { %v3475_v12 = vpop.eup %3474  ;;  %v1316_v14 = vmul.f32 0.6931472, %v3473_v10  ;;  %v1588_v10 = vld [vmem:[#allocation7 + $0x138] sm:$0xff] }
 0x55e   : > { %v3477_v16 = vpop.eup %3476  ;;  %v1325_v19 = vmul.f32 0.6931472, %v3475_v12  ;;  %v3288_v12 = vpack.c.bf16 %v1588_v10, %v1587_v9 }
 0x55f   : > { %v1322_v21 = vsel %vm1321_vm1, %v1319_v15, %v1316_v14  ;;  %v1334_v22 = vmul.f32 0.6931472, %v3477_v16  ;;  %vm1297_vm1 = vcmp.ne.f32.partialorder %v4323_v38, %v4323_v38  ;;  %v1590_v14 = vld [vmem:[#allocation7 + $0x148] sm:$0xff]  ;;  %v1591_v16 = vld [vmem:[#allocation7 + $0x150] sm:$0xff] }
 0x560   : > { %v1341_v25 = vadd.f32 %v1322_v21, %v1293_v13  ;;  %v1331_v26 = vsel %vm1330_vm8, %v1328_v20, %v1325_v19  ;;  %vm1298_vm8 = vcmp.ne.f32.partialorder %v4325_v40, %v4325_v40  ;;  %v1589_v13 = vld [vmem:[#allocation7 + $0x140] sm:$0xff]  ;;  %v1594_v21 = vld [vmem:[#allocation7 + $0x168] sm:$0xff] }
 0x561   : > { %v1342_v30 = vadd.f32 %v1331_v26, %v1294_v17  ;;  %v1340_v31 = vsel %vm1339_vm11, %v1337_v24, %v1334_v22  ;;  %vm4678_vm11 = vcmask 1040384   ;;  %v3291_v15 = vpack.c.bf16 %v1590_v14, %v1589_v13  ;;  %v1592_v17 = vld [vmem:[#allocation7 + $0x158] sm:$0xff]  ;;  %v1593_v20 = vld [vmem:[#allocation7 + $0x160] sm:$0xff]  ;;  %v1595_v24 = vld [vmem:[#allocation7 + $0x170] sm:$0xff] }
 0x562   : > { %v1344_v32 = vsel %vm1296_vm12, %v4321_v37, %v1341_v25  ;;  %v1343_v35 = vadd.f32 %v1340_v31, %v1295_v29  ;;  %v3294_v19 = vpack.c.bf16 %v1592_v17, %v1591_v16  ;;  %v3297_v22 = vpack.c.bf16 %v1594_v21, %v1593_v20  ;;  %v1596_v25 = vld [vmem:[#allocation7 + $0x178] sm:$0xff] }
 0x563   : > { %3478 = vtanh.f32 %v1344_v32  ;;  %v1345_v36 = vsel %vm1297_vm1, %v4323_v38, %v1342_v30  ;;  %v3300_v26 = vpack.c.bf16 %v1596_v25, %v1595_v24  ;;  %vm4680_vm12 = vcmask 1046528  }
 0x564   : > { %3480 = vtanh.f32 %v1345_v36  ;;  %v1346_v41 = vsel %vm1298_vm8, %v4325_v40, %v1343_v35  ;;  %vm4681_vm1 = vmmov %vm4680_vm12 }
 0x565   : > { %3482 = vtanh.f32 %v1346_v41  ;;  %vm4682_vm8 = vmmov %vm4681_vm1 }
 0x56d   : > { %v3479_v61 = vpop.eup %3478 }
 0x56e   : > { %v3481_v62 = vpop.eup %3480  ;;  %v1350_v43 = vmul.f32 %v3479_v61, %v4321_v37 }
 0x56f   : > { %v3483_v49 = vpop.eup %3482  ;;  %v1351_v52 = vmul.f32 %v3481_v62, %v4323_v38  ;;  %v3282_v38 = vpack.c.bf16 %v1584_v27, %v1583_v63 }
 0x570   : > { %v1360_v53 = vadd.f32 %v2407_v59, %v1350_v43  ;;  %v1352_v57 = vmul.f32 %v3483_v49, %v4325_v40 }
 0x571   : > { %v4353_v3 = vadd.f32 %v2407_v59, %v1351_v52 }
 0x572   : > { %v4351_v60 = vmul.f32 %v4244_v18, %v1360_v53  ;;  %v1362_v2 = vadd.f32 %v2407_v59, %v1352_v57 }
 0x573   : > { %v1370_v6 = vrot.slane %v4353_v3, 7  ;;  %v1572_v30 = vrot.slane %v4353_v3, 1 }
 0x574   : > { %2899 = vmatmul.mubr.f32.vlgmr.msra.gmra.mrb[12].mxu1 %v4351_v60  ;;  %v1369_v37 = vrot.slane %v4351_v60, 7  ;;  %v4360_v40 = vmul.f32 %v4247_v23, %v1362_v2  ;;  %v1571_v29 = vrot.slane %v4351_v60, 1 }
 0x575   : > { %3280 = vmatpush3.bf16.msra.mxu1 %v3279_v58  ;;  %2901 = vmatprep.mubr.msk.f32.mxu1 %vm3704_vm0, %v3705_v1 }
 0x576   : > { %2940 = vmatmul.mubr.msk.f32.vlgmr.msra.gmra.mrb[14].mxu0 %vm4030_vm2, %v1369_v37  ;;  %3281 = vmatprep.subr.bf16.mxu1 %v3703_v0  ;;  %v1371_v56 = vsel %vm4678_vm11, %v1369_v37, %v1370_v6  ;;  %v1372_v8 = vrot.slane %v4360_v40, 7  ;;  %vm4679_vm2 = vmmov %vm4678_vm11  ;;  %v1573_v31 = vsel %vm4680_vm12, %v1571_v29, %v1572_v30  ;;  %v1574_v32 = vrot.slane %v4360_v40, 1  ;;  %v2411_v37 = vld [vmem:[%s4620_s7] ss:$0 sm:$0xff] }
 0x577   : > { %2942 = vmatprep.mubr.msk.f32.mxu0 %vm3704_vm0, %v3705_v1  ;;  %3304 = vmatpush3.bf16.msk.msra.mxu0 %vm4096_vm10, %v3706_v34 }
 0x578   : > { %2902 = vmatmul.mubr.f32.gmra.mrb[14].mxu1 %v4353_v3  ;;  %3305 = vmatprep.subr.bf16.mxu0 %v3703_v0  ;;  %v1373_v11 = vsel %vm4679_vm2, %v1370_v6, %v1372_v8  ;;  %v1575_v35 = vsel %vm4681_vm1, %v1572_v30, %v1574_v32 }
 0x579   : > { %3283 = vmatpush3.bf16.msra.mxu1 %v3282_v38  ;;  %2904 = vmatprep.mubr.msk.f32.mxu1 %vm3704_vm0, %v3705_v1 }
 0x57a   : > { %2943 = vmatmul.mubr.f32.gmra.mrb[16].mxu0 %v1371_v56  ;;  %3284 = vmatprep.subr.bf16.mxu1 %v3703_v0 }
 0x57b   : > { %2945 = vmatprep.mubr.msk.f32.mxu0 %vm3704_vm0, %v3705_v1  ;;  %3307 = vmatpush3.bf16.msk.msra.mxu0 %vm4120_vm5, %v3706_v34 }
 0x57c   : > { %2905 = vmatmul.mubr.f32.gmra.mrb[16].mxu1 %v4360_v40  ;;  %3308 = vmatprep.subr.bf16.mxu0 %v3703_v0 }
 0x57d   : > { %3286 = vmatpush3.bf16.msra.mxu1 %v3285_v7  ;;  %2980 = vmatprep.mubr.msk.f32.mxu1 %vm3704_vm0, %v3705_v1 }
 0x57e   : > { %2946 = vmatmul.mubr.f32.gmra.mrb[18].mxu0 %v1373_v11  ;;  %3287 = vmatprep.subr.bf16.mxu1 %v3703_v0 }
 0x57f   : > { %3310 = vmatpush3.bf16.msk.msra.mxu0 %vm4138_vm13, %v3706_v34  ;;  %3021 = vmatprep.mubr.msk.f32.mxu0 %vm3704_vm0, %v3705_v1 }
 0x580   : > { %3311 = vmatprep.subr.bf16.mxu0 %v3703_v0 }
 0x581   : > { %3289 = vmatpush3.bf16.msra.mxu1 %v3288_v12 }
 0x582   : > { %3290 = vmatprep.subr.bf16.mxu1 %v3703_v0 }
 0x583   : > { %3313 = vmatpush3.bf16.msk.msra.mxu0 %vm4156_vm9, %v3706_v34 }
 0x584   : > { %3314 = vmatprep.subr.bf16.mxu0 %v3703_v0 }
 0x585   : > { %3292 = vmatpush3.bf16.msra.mxu1 %v3291_v15 }
 0x586   : > { %3293 = vmatprep.subr.bf16.mxu1 %v3703_v0 }
 0x587   : > { %3316 = vmatpush3.bf16.msk.msra.mxu0 %vm4174_vm7, %v3706_v34 }
 0x588   : > { %3317 = vmatprep.subr.bf16.mxu0 %v3703_v0 }
 0x589   : > { %3295 = vmatpush3.bf16.msra.mxu1 %v3294_v19 }
 0x58a   : > { %3296 = vmatprep.subr.bf16.mxu1 %v3703_v0 }
 0x58b   : > { %3319 = vmatpush3.bf16.msk.msra.mxu0 %vm4192_vm6, %v3706_v34 }
 0x58c   : > { %3320 = vmatprep.subr.bf16.mxu0 %v3703_v0 }
 0x58d   : > { %3298 = vmatpush3.bf16.msra.mxu1 %v3297_v22 }
 0x58e   : > { %3299 = vmatprep.subr.bf16.mxu1 %v3703_v0 }
 0x58f   : > { %3322 = vmatpush3.bf16.msk.msra.mxu0 %vm4210_vm4, %v3706_v34 }
 0x590   : > { %3323 = vmatprep.subr.bf16.mxu0 %v3703_v0 }
 0x591   : > { %3301 = vmatpush3.bf16.msra.mxu1 %v3300_v26 }
 0x592   : > { %3024 = vmatprep.subr.mxu1 %v3705_v1 }
 0x593   : > { %3325 = vmatpush3.bf16.msk.msra.mxu0 %vm4226_vm15, %v3706_v34 }
 0x594   : > { %2981 = vmatmul.mubr.f32.vlgmr.msra.gmra.mrb[18].mxu1 %v1573_v31  ;;  %3350 = vmatprep.subr.bf16.mxu0 %v3703_v0 }
 0x595   : > { %2983 = vmatprep.mubr.msk.f32.mxu1 %vm3704_vm0, %v3705_v1  ;;  %3025 = vmatpush3.msk.msra.mxu1 %vm4255_vm14, %v3707_v46 }
 0x596   : > { %3326 = vmatprep.subr.bf16.mxu1 %v3703_v0 }
 0x598   : > { %2984 = vmatmul.mubr.f32.gmra.mrb[20].mxu1 %v1575_v35 }
 0x599   : > { %2986 = vmatprep.mubr.msk.f32.mxu1 %vm3704_vm0, %v3705_v1 }
 0x59c   : > { %2987 = vmatmul.mubr.msk.f32.gmra.mrb[22].mxu1 %vm4682_vm8, %v1574_v32 }
 0x59d   : > { %3026 = vmatprep.mubr.msk.f32.mxu1 %vm3704_vm0, %v3705_v1 }
 0x647   : > { %v1477_v36 = vpop.f32.mrb[12].mxu1 }
 0x648   : > { %v2900_v41 = vpop.f32.mrb[13].mxu1 }
 0x649   : > { %v1557_v61 = vpop.f32.mrb[14].mxu0 }
 0x64a   : > { %v1558_v59 = vadd.f32 %v1557_v61, %v1477_v36  ;;  %v2941_v62 = vpop.f32.mrb[15].mxu0 }
 0x64b   : > { %v1482_v43 = vpop.f32.mrb[14].mxu1  ;;  %v2099_v62 = vld [vmem:[#allocation8 + $0x8] sm:$0xff] }
 0x64c   : > { %v2903_v47 = vpop.f32.mrb[15].mxu1 }
 0x64d   : > { %v1562_v28 = vpop.f32.mrb[16].mxu0 }
 0x64e   : > { %v1563_v49 = vadd.f32 %v1562_v28, %v1482_v43  ;;  %v2944_v52 = vpop.f32.mrb[17].mxu0  ;;  %v2100_v43 = vld [vmem:[#allocation8 + $0x10] sm:$0xff]  ;;  %v2101_v28 = vld [vmem:[#allocation8 + $0x18] sm:$0xff] }
 0x64f   : > { %v1487_v53 = vpop.f32.mrb[16].mxu1  ;;  %v2102_v52 = vld [vmem:[#allocation8 + $0x20] sm:$0xff] }
 0x650   : > { %v2906_v57 = vpop.f32.mrb[17].mxu1 }
 0x651   : > { %v1567_v58 = vpop.f32.mrb[18].mxu0 }
 0x652   : > { %v1568_v60 = vadd.f32 %v1567_v58, %v1487_v53  ;;  %v2947_v63 = vpop.f32.mrb[19].mxu0  ;;  %v2103_v53 = vld [vmem:[#allocation8 + $0x28] sm:$0xff] }
 0x653   : > { %v3357_v57 = vpack.c.bf16 %v2103_v53, %v2102_v52  ;;  %v2107_v63 = vld [vmem:[#allocation8 + $0x48] sm:$0xff] }
 0x667   : > { %v1663_v27 = vpop.f32.mrb[18].mxu1 }
 0x668   : > { %v1677_v2 = vadd.f32 %v1663_v27, %v1558_v59  ;;  %v2982_v3 = vpop.f32.mrb[19].mxu1  ;;  %v2098_v59 = vld [vmem:[#allocation8] sm:$0xff] }
 0x669   : > { %v3351_v47 = vpack.c.bf16 %v2099_v62, %v2098_v59  ;;  %v2109_v3 = vld [vmem:[#allocation8 + $0x58] sm:$0xff] }
 0x66a   : > { %v1687_v5 = vadd.f32 %v2411_v37, %v1677_v2  ;;  %v2108_v2 = vld [vmem:[#allocation8 + $0x50] sm:$0xff] }
 0x66b   : > { %v1668_v38 = vpop.f32.mrb[20].mxu1 }
 0x66c   : > { %v1678_v40 = vadd.f32 %v1668_v38, %v1563_v49  ;;  %v2985_v4 = vpop.f32.mrb[21].mxu1  ;;  %v1692_v9 = vmul.f32 %v4244_v18, %v1687_v5  ;;  %v3354_v49 = vpack.c.bf16 %v2101_v28, %v2100_v43  ;;  %v2110_v38 = vld [vmem:[#allocation8 + $0x60] sm:$0xff] }
 0x66e   : > { %v1688_v56 = vadd.f32 %v2411_v37, %v1678_v40  ;;  %v2111_v40 = vld [vmem:[#allocation8 + $0x68] sm:$0xff] }
 0x66f   : > { %v1673_v6 = vpop.f32.mrb[22].mxu1  ;;  %v3369_v4 = vpack.c.bf16 %v2111_v40, %v2110_v38 }
 0x670   : > { %v1679_v7 = vadd.f32 %v1673_v6, %v1568_v60  ;;  %v2988_v8 = vpop.f32.mrb[23].mxu1  ;;  %v1695_v11 = vadd.f32 %v1692_v9, %v1688_v56  ;;  %v2106_v60 = vld [vmem:[#allocation8 + $0x40] sm:$0xff]  ;;  %v2113_v6 = vld [vmem:[#allocation8 + $0x78] sm:$0xff] }
 0x671   : > { %v3363_v27 = vpack.c.bf16 %v2107_v63, %v2106_v60  ;;  %v3505_v8 = vld [vmem:[%s3987_s15 + $0x8] sm:$0xff]  ;;  %v3506_v9 = vld [vmem:[%s3987_s15 + $0x10] sm:$0xff] }
 0x672   : > { %v1689_v10 = vadd.f32 %v2411_v37, %v1679_v7  ;;  %v3366_v37 = vpack.c.bf16 %v2109_v3, %v2108_v2  ;;  %v3504_v7 = vld [vmem:[%s3987_s15] sm:$0xff]  ;;  %s4686_s15 = sld [smem:[#allocation20_spill]] }
 0x674   : > { %v1694_v12 = vmul.f32 %v4247_v23, %v1689_v10 }
 0x676   : > { %v1696_v13 = vadd.f32 %v1695_v11, %v1694_v12 }
 0x678   : > { %v1697_v14 = vrot.slane %v1696_v13, 4  ;;  %s4569_s27 = scalar_lea.hbm %s4686_s15, %s3377_s9 }
 0x67a   : > { %v1698_v15 = vadd.f32 %v1697_v14, %v1696_v13 }
 0x67c   : > { %v1699_v16 = vrot.slane %v1698_v15, 2 }
 0x67e   : > { %v1700_v17 = vadd.f32 %v1699_v16, %v1698_v15 }
 0x680   : > { %v1701_v19 = vrot.slane %v1700_v17, 1 }
 0x682   : > { %v1702_v20 = vadd.f32 %v1701_v19, %v1700_v17 }
 0x684   : > { %3022 = vmatmul.mubr.f32.vlgmr.msra.gmra.mrb[20].mxu0 %v1702_v20 }
 0x685   : > { %3101 = vmatprep.mubr.msk.f32.mxu0 %vm3704_vm0, %v3705_v1  ;;  %3352 = vmatpush3.bf16.msra.mxu0 %v3351_v47 }
 0x686   : > { %3353 = vmatprep.subr.bf16.mxu0 %v3703_v0 }
 0x689   : > { %3355 = vmatpush3.bf16.msra.mxu0 %v3354_v49 }
 0x68a   : > { %3356 = vmatprep.subr.bf16.mxu0 %v3703_v0 }
 0x68d   : > { %3358 = vmatpush3.bf16.msra.mxu0 %v3357_v57 }
 0x68e   : > { %3359 = vmatprep.subr.bf16.mxu0 %v3703_v0 }
 0x757   : > { %v1769_v21 = vpop.f32.mrb[20].mxu0 }
 0x758   : > { %v1773_v22 = vmul.f32 0.015625, %v1769_v21  ;;  %v3023_v24 = vpop.f32.mrb[21].mxu0 }
 0x759   : > { %v2448_v24 = vld [vmem:[%s4683_s29] ss:$0 sm:$0xff]  ;;  %s3621_s29 = scalar_lea.vmem %s4563_s20, 384 }
 0x75a   : > { %3027 = vmatmul.mubr.msk.f32.vlgmr.msra.gmra.mrb[24].mxu1 %vm1028_vm3, %v1773_v22  ;;  %p3622_p3 = scmp.ne.s32.totalorder %s4563_s20, %s3621_s29 }
 0x75b   : > { %3328 = vmatpush3.bf16.msk.msra.mxu1 %vm4096_vm10, %v3706_v34  ;;  %3061 = vmatprep.mubr.msk.f32.mxu1 %vm3704_vm0, %v3705_v1 }
 0x75c   : > { %3329 = vmatprep.subr.bf16.mxu1 %v3703_v0  ;;  %p3623_p7 = pnand %p3622_p3, %p3930_p5 }
 0x75e   : > { %p3624_p12 = pneg %p3623_p7 }
 0x75f   : > { %3331 = vmatpush3.bf16.msk.msra.mxu1 %vm4120_vm5, %v3706_v34 }
 0x760   : > { %3332 = vmatprep.subr.bf16.mxu1 %v3703_v0 }
 0x763   : > { %3334 = vmatpush3.bf16.msk.msra.mxu1 %vm4138_vm13, %v3706_v34 }
 0x764   : > { %3335 = vmatprep.subr.bf16.mxu1 %v3703_v0 }
 0x767   : > { %3337 = vmatpush3.bf16.msk.msra.mxu1 %vm4156_vm9, %v3706_v34 }
 0x768   : > { %3338 = vmatprep.subr.bf16.mxu1 %v3703_v0 }
 0x76b   : > { %3340 = vmatpush3.bf16.msk.msra.mxu1 %vm4174_vm7, %v3706_v34 }
 0x76c   : > { %3341 = vmatprep.subr.bf16.mxu1 %v3703_v0 }
 0x76f   : > { %3343 = vmatpush3.bf16.msk.msra.mxu1 %vm4192_vm6, %v3706_v34 }
 0x770   : > { %3344 = vmatprep.subr.bf16.mxu1 %v3703_v0 }
 0x773   : > { %3346 = vmatpush3.bf16.msk.msra.mxu1 %vm4210_vm4, %v3706_v34 }
 0x774   : > { %3347 = vmatprep.subr.bf16.mxu1 %v3703_v0 }
 0x777   : > { %3349 = vmatpush3.bf16.msk.msra.mxu1 %vm4226_vm15, %v3706_v34 }
 0x778   : > { %3064 = vmatprep.subr.mxu1 %v3705_v1 }
 0x82d   : > { %v1843_v33 = vpop.f32.mrb[24].mxu1 }
 0x82e   : > { %v1850_v39 = vrot.slane %v1843_v33, %v4273_v50  ;;  %v3028_v42 = vpop.f32.mrb[25].mxu1 }
 0x830   : > { %v1851_v45 = vsub.f32 %v1687_v5, %v1850_v39  ;;  %v4479_v48 = vsub.f32 %v1688_v56, %v1850_v39  ;;  %v1853_v51 = vsub.f32 %v1689_v10, %v1850_v39  ;;  %v2112_v5 = vld [vmem:[#allocation8 + $0x70] sm:$0xff] }
 0x831   : > { %v3372_v56 = vpack.c.bf16 %v2113_v6, %v2112_v5 }
 0x832   : > { %v4482_v25 = vmul.f32 %v4244_v18, %v1851_v45  ;;  %v4485_v54 = vmul.f32 %v4247_v23, %v1853_v51  ;;  %v1858_v34 = vmul.f32 %v4479_v48, %v4479_v48  ;;  %v2449_v45 = vld [vmem:[%s4684_s14] ss:$0 sm:$0xff]  ;;  %s3627_s14 = scalar_lea.vmem %s3626_s8, 768 }
 0x833   : > { %p3629_p2 = scmp.lt.s32.totalorder %s3627_s14, %s3621_s29 }
 0x834   : > { %v1857_v55 = vmul.f32 %v4482_v25, %v4482_v25  ;;  %v1859_v26 = vmul.f32 %v4485_v54, %v4485_v54 }
 0x835   : > { %p3630_p4 = por %p3629_p2, %p3628_p1 }
 0x836   : > { %v1860_v29 = vadd.f32 %v1858_v34, %v1857_v55 }
 0x837   : > { %p3631_p9 = pnand %p3630_p4, %p3624_p12 }
 0x838   : > { %v1861_v30 = vadd.f32 %v1860_v29, %v1859_v26 }
 0x83a   : > { %v1862_v31 = vrot.slane %v1861_v30, 4 }
 0x83c   : > { %v1863_v32 = vadd.f32 %v1862_v31, %v1861_v30 }
 0x83e   : > { %v1864_v35 = vrot.slane %v1863_v32, 2 }
 0x840   : > { %v1865_v36 = vadd.f32 %v1864_v35, %v1863_v32 }
 0x842   : > { %v1866_v41 = vrot.slane %v1865_v36, 1 }
 0x844   : > { %v1867_v61 = vadd.f32 %v1866_v41, %v1865_v36 }
 0x846   : > { %3062 = vmatmul.mubr.f32.vlgmr.msra.gmra.mrb[26].mxu1 %v1867_v61 }
 0x847   : > { %3065 = vmatpush3.msk.msra.mxu1 %vm4255_vm14, %v3707_v46  ;;  %3066 = vmatprep.mubr.msk.f32.mxu1 %vm3704_vm0, %v3705_v1  ;;  %v2105_v46 = vld [vmem:[#allocation8 + $0x38] sm:$0xff] }
 0x848   : > { %v3360_v58 = vpack.c.bf16 %v2105_v46, %v2104_v44 }
 0x84a   : > { %3361 = vmatpush3.bf16.msra.mxu0 %v3360_v58 }
 0x84b   : > { %3362 = vmatprep.subr.bf16.mxu0 %v3703_v0 }
 0x84e   : > { %3364 = vmatpush3.bf16.msra.mxu0 %v3363_v27 }
 0x84f   : > { %3365 = vmatprep.subr.bf16.mxu0 %v3703_v0 }
 0x852   : > { %3367 = vmatpush3.bf16.msra.mxu0 %v3366_v37 }
 0x853   : > { %3368 = vmatprep.subr.bf16.mxu0 %v3703_v0 }
 0x856   : > { %3370 = vmatpush3.bf16.msra.mxu0 %v3369_v4 }
 0x857   : > { %3371 = vmatprep.subr.bf16.mxu0 %v3703_v0 }
 0x85a   : > { %3373 = vmatpush3.bf16.msra.mxu0 %v3372_v56 }
 0x85d   : > { %3102 = vmatmul.mubr.f32.vlgmr.msra.gmra.mrb[22].mxu0 %v3504_v7 }
 0x85e   : > { %3104 = vmatprep.mubr.msk.f32.mxu0 %vm3704_vm0, %v3705_v1 }
 0x861   : > { %3105 = vmatmul.mubr.f32.gmra.mrb[24].mxu0 %v3505_v8 }
 0x862   : > { %3107 = vmatprep.mubr.msk.f32.mxu0 %vm3704_vm0, %v3705_v1 }
 0x865   : > { %3108 = vmatmul.mubr.f32.gmra.mrb[26].mxu0 %v3506_v9 }
 0x919   : > { %v1934_v10 = vpop.f32.mrb[26].mxu1 }
 0x91a   : > { %v1938_v11 = vmul.f32 0.015625, %v1934_v10  ;;  %v3063_v12 = vpop.f32.mrb[27].mxu1 }
 0x91c   : > { %3067 = vmatmul.mubr.msk.f32.vlgmr.msra.gmra.mrb[28].mxu1 %vm1028_vm3, %v1938_v11 }
 0x930   : > { %v4513_v13 = vpop.f32.mrb[22].mxu0 }
 0x931   : > { %v3103_v0 = vpop.f32.mrb[23].mxu0 }
 0x934   : > { %v4515_v14 = vpop.f32.mrb[24].mxu0 }
 0x935   : > { %v3106_v15 = vpop.f32.mrb[25].mxu0 }
 0x938   : > { %v4517_v16 = vpop.f32.mrb[26].mxu0 }
 0x939   : > { %v3109_v17 = vpop.f32.mrb[27].mxu0 }
 0x9ef   : > { %v2008_v19 = vpop.f32.mrb[28].mxu1 }
 0x9f0   : > { %v2009_v20 = vadd.f32 1e-05, %v2008_v19  ;;  %v3068_v21 = vpop.f32.mrb[29].mxu1 }
 0x9f1   : > { %v2450_v21 = vld [vmem:[%s4685_s16] ss:$0 sm:$0xff] }
 0x9f2   : > { %3484 = vrsqrt.f32 %v2009_v20 }
 0x9fc   : > { %v3485_v1 = vpop.eup %3484 }
 0x9fd   : > { %v2016_v22 = vrot.slane %v3485_v1, %v4273_v50 }
 0x9ff   : > { %v2017_v33 = vmul.f32 %v2016_v22, %v4482_v25  ;;  %v2018_v39 = vmul.f32 %v2016_v22, %v4479_v48  ;;  %v2019_v42 = vmul.f32 %v2016_v22, %v4485_v54 }
 0xa01   : > { %v2026_v51 = vmul.f32 %v2448_v24, %v2017_v33  ;;  %v2027_v55 = vmul.f32 %v2448_v24, %v2018_v39  ;;  %v2028_v34 = vmul.f32 %v2448_v24, %v2019_v42  ;;  %v2188_v33 = vadd.f32 %v2450_v21, %v4513_v13 }
 0xa02   : > { %v2198_v39 = vadd.f32 %v2450_v21, %v4517_v16 }
 0xa03   : > { %v4529_v26 = vadd.f32 %v2449_v45, %v2026_v51  ;;  %v4531_v50 = vadd.f32 %v2449_v45, %v2027_v55  ;;  %v4533_v29 = vadd.f32 %v2449_v45, %v2028_v34  ;;  %v2193_v51 = vadd.f32 %v2450_v21, %v4515_v14 }
 0xa05   : > { %v2047_v30 = vand.u32 2147483647, %v4529_v26  ;;  %v2048_v25 = vand.u32 2147483647, %v4531_v50  ;;  %v2049_v54 = vand.u32 2147483647, %v4533_v29  ;;  %vm2041_vm13 = vcmp.ne.f32.partialorder %v4529_v26, %v4529_v26 }
 0xa06   : > { %v2038_v3 = vmax.f32 %v4529_v26, 0.0  ;;  %v2039_v4 = vmax.f32 %v4531_v50, 0.0  ;;  %v2040_v11 = vmax.f32 %v4533_v29, 0.0  ;;  %vm2042_vm9 = vcmp.ne.f32.partialorder %v4531_v50, %v4531_v50 }
 0xa07   : > { %v2050_v48 = vsub.f32 0.0, %v2047_v30  ;;  %v2051_v31 = vsub.f32 0.0, %v2048_v25  ;;  %v2052_v35 = vsub.f32 0.0, %v2049_v54  ;;  %vm2043_vm7 = vcmp.ne.f32.partialorder %v4533_v29, %v4533_v29 }
 0xa09   : > { %v2053_v32 = vmul.f32 1.442695, %v2050_v48  ;;  %v2055_v36 = vmul.f32 1.442695, %v2051_v31  ;;  %v2057_v41 = vmul.f32 1.442695, %v2052_v35 }
 0xa0b   : > { %3486 = vpow2.f32 %v2053_v32 }
 0xa0c   : > { %3488 = vpow2.f32 %v2055_v36 }
 0xa0d   : > { %3490 = vpow2.f32 %v2057_v41 }
 0xa15   : > { %v3487_v61 = vpop.eup %3486 }
 0xa16   : > { %v3489_v59 = vpop.eup %3488  ;;  %v2059_v62 = vadd.f32 1.0, %v3487_v61  ;;  %v2062_v49 = vmul.f32 -0.5, %v3487_v61  ;;  %v2065_v44 = vand.u32 2147483647, %v3487_v61 }
 0xa17   : > { %v3491_v43 = vpop.eup %3490  ;;  %v2068_v47 = vadd.f32 1.0, %v3489_v59  ;;  %v2071_v52 = vmul.f32 -0.5, %v3489_v59  ;;  %v2074_v58 = vand.u32 2147483647, %v3489_v59 }
 0xa18   : > { %3492 = vlog2.f32 %v2059_v62  ;;  %v2077_v28 = vadd.f32 1.0, %v3491_v43  ;;  %v2080_v53 = vmul.f32 -0.5, %v3491_v43  ;;  %v2063_v57 = vadd.f32 1.0, %v2062_v49 }
 0xa19   : > { %3494 = vlog2.f32 %v2068_v47  ;;  %v2072_v46 = vadd.f32 1.0, %v2071_v52  ;;  %v2083_v27 = vand.u32 2147483647, %v3491_v43  ;;  %vm2066_vm0 = vcmp.lt.f32.partialorder %v2065_v44, 0.0004427343 }
 0xa1a   : > { %3496 = vlog2.f32 %v2077_v28  ;;  %v2081_v60 = vadd.f32 1.0, %v2080_v53  ;;  %v2064_v38 = vmul.f32 %v3487_v61, %v2063_v57  ;;  %vm2075_vm10 = vcmp.lt.f32.partialorder %v2074_v58, 0.0004427343 }
 0xa1b   : > { %v2073_v6 = vmul.f32 %v3489_v59, %v2072_v46  ;;  %vm2084_vm5 = vcmp.lt.f32.partialorder %v2083_v27, 0.0004427343 }
 0xa1c   : > { %v2082_v8 = vmul.f32 %v3491_v43, %v2081_v60 }
 0xa22   : > { %v3493_v63 = vpop.eup %3492 }
 0xa23   : > { %v3495_v2 = vpop.eup %3494  ;;  %v2061_v37 = vmul.f32 0.6931472, %v3493_v63 }
 0xa24   : > { %v3497_v40 = vpop.eup %3496  ;;  %v2070_v5 = vmul.f32 0.6931472, %v3495_v2 }
 0xa25   : > { %v2067_v56 = vsel %vm2066_vm0, %v2064_v38, %v2061_v37  ;;  %v2079_v7 = vmul.f32 0.6931472, %v3497_v40 }
 0xa26   : > { %v2086_v9 = vadd.f32 %v2067_v56, %v2038_v3  ;;  %v2076_v10 = vsel %vm2075_vm10, %v2073_v6, %v2070_v5 }
 0xa27   : > { %v2087_v12 = vadd.f32 %v2076_v10, %v2039_v4  ;;  %v2085_v0 = vsel %vm2084_vm5, %v2082_v8, %v2079_v7 }
 0xa28   : > { %v2089_v15 = vsel %vm2041_vm13, %v4529_v26, %v2086_v9  ;;  %v2088_v17 = vadd.f32 %v2085_v0, %v2040_v11 }
 0xa29   : > { %3498 = vtanh.f32 %v2089_v15  ;;  %v2090_v19 = vsel %vm2042_vm9, %v4531_v50, %v2087_v12 }
 0xa2a   : > { %3500 = vtanh.f32 %v2090_v19  ;;  %v2091_v20 = vsel %vm2043_vm7, %v4533_v29, %v2088_v17 }
 0xa2b   : > { %3502 = vtanh.f32 %v2091_v20 }
 0xa33   : > { %v3499_v1 = vpop.eup %3498 }
 0xa34   : > { %v3501_v22 = vpop.eup %3500  ;;  %v2095_v24 = vmul.f32 %v3499_v1, %v4529_v26 }
 0xa35   : > { %v3503_v42 = vpop.eup %3502  ;;  %v2096_v45 = vmul.f32 %v3501_v22, %v4531_v50 }
 0xa36   : > { %v2201_v55 = vadd.f32 %v2188_v33, %v2095_v24  ;;  %v2097_v34 = vmul.f32 %v3503_v42, %v4533_v29 }
 0xa37   : > { %v2202_v30 = vadd.f32 %v2193_v51, %v2096_v45 }
 0xa38   : > { %v2204_v26 = vmul.f32 %v4244_v18, %v2201_v55  ;;  %v2203_v13 = vadd.f32 %v2198_v39, %v2097_v34 }
 0xa39   : > { %2208 = vst [vmem:[%s486_s19 + $0x8] sm:$0xff] %v2202_v30 }
 0xa3a   : > { %2207 = vst [vmem:[%s486_s19] sm:$0xff] %v2204_v26  ;;  %v2206_v16 = vmul.f32 %v4247_v23, %v2203_v13 }
 0xa3c   : > { %2209 = vst [vmem:[%s486_s19 + $0x10] sm:$0xff] %v2206_v16 }
 0xa3d   : > { %3634 = shalt.err (!%p3631_p9)
}
 0xa3e   : > { %s3635_s26 = scalar_lea.hbm %s4569_s27, 384  ;;  %s3639_s19 = scalar_lea.hbm %s4686_s15, 768 }
 0xa3f   : > { %p3636_p0 = scmp.ne.s32.totalorder %s4569_s27, %s3635_s26  ;;  %p3640_p13 = scmp.lt.u32.totalorder %s4569_s27, %s4686_s15 }
 0xa40   : > { %p3641_p6 = scmp.lt.u32.totalorder %s3639_s19, %s3635_s26  ;;  %p3643_p3 = scmp.lt.u32.totalorder %s3635_s26, %s4569_s27 }
 0xa41   : > { %p3637_p11 = pnand %p3636_p0, %p3930_p5 }
 0xa42   : > { %p3642_p10 = por %p3641_p6, %p3640_p13 }
 0xa43   : > { %p3638_p8 = pneg %p3637_p11 }
 0xa44   : > { %p3644_p7 = por %p3643_p3, %p3642_p10 }
 0xa46   : > { %p3645_p12 = pnand %p3644_p7, %p3638_p8 }
 0xa48   : > { %3648 = shalt.err (!%p3645_p12)
}
 0xa49   : > { %s3709_s28 = smov 128   ;;  %s3710_s29 = smov 8  }
 0xa4a   : > { %3392 = dma.vmem_to_hbm [thread:$0]  (%p3930_p5), %s4563_s20, 384, %s4569_s27, %s2211_s25, %s3709_s28, %s3709_s28, %s3710_s29  }
 0xa4b PF: > { %s4687_s13 = sld [smem:[#allocation15_spill]]  ;;  %s4688_s8 = sld [smem:[#allocation16_spill]] }
 0xa4c   : > { %p4690_p2 = scmp.ge.s32.totalorder %s3695_s24, 2 }
 0xa51   : > { %s2239_s14 = sand.u32 1, %s4687_s13   ;;  %p4689_p1 = scmp.ne.s32.totalorder %s4688_s8, 0 }
 0xa52   : > { %s2240_s26 = scalar_lea.sflag [#allocation4], %s2239_s14 }
 0xa53   : > { %p3409_p4 = pnand %p4690_p2, %p4689_p1 }
 0xa55   : > { %3678 = dma.done.wait (!%p3409_p4), %s2240_s26, 384  }
 0xa56   : > { %3680 = vsyncadd (!%p3409_p4), %s2240_s26, 4294966912  ;;  %s4691_s18 = smov %s3916_s21  ;;  %p27_p9 = scmp.ge.s32.totalorder %s3916_s21, 4  }
 0xa57   : > { %s4692_s21 = smov %s3687_s22  ;;  %s4693_s22 = smov %s3691_s23 }
 0xa58   : > { %s4694_s23 = smov %s3926_s11  ;;  %s4695_s24 = smov %s4691_s18 }
 0xa59   :  { %29 = sbr.rel (!%p27_p9) target bundleno = 12 (0xc), region = 132 }
 0xa60   :  { %2245 = vsyncpa [#allocation3], 1 }
 0xa61   :  { %2247 = vsyncpa [#allocation3 + $0x1], 1 }
 0xa62   :  { %2248 = vsyncpa [#allocation6], 1 }
 0xa63   :  { %2249 = vsyncpa [#allocation9], 1 }
 0xa64   :  { %2250 = vsyncpa [#allocation4], 1 }
 0xa65   :  { %2252 = vsyncpa [#allocation4 + $0x1], 1 }

</bundles_post_ra>
